<compile_context>
chip_gen: v7x
topology: tpu7x:2x2x1
jax: 0.10.0
libtpu: 0.0.40
codegen_flags: <defaults>
</compile_context>

<pallas_src>
import functools

import numpy as np

import jax
import jax.numpy as jnp
from jax import lax
from jax.experimental import pallas as pl
from jax.experimental.pallas import tpu as pltpu


def _round_up(x, m):
    return (x + m - 1) // m * m


# ----------------------------------------------------------------------------
# Fused kernel: 3x3 conv (in-kernel taps) -> ReLU -> 1x1 conv -> folded
#               cross-attention -> residual -> LayerNorm      (one batch/step)
# ----------------------------------------------------------------------------
def _fused_kernel(xbuf_ref, dec_ref, mask_ref,
                  w1_ref, b1_ref, w2t_ref, b2t_ref,
                  wqk_ref, bqk_ref, wvo_ref, bvo_ref,
                  gamma_ref, beta_ref, out_ref,
                  *, hidden_dim, wp, ls):
    # ---- gradient_proj: 3x3 conv (padding=1) as 9 shifted-window matmuls ----
    # xbuf holds the zero-padded image flattened row-major with row stride wp;
    # slab position p = h*wp + w, tap (kh,kw) reads xbuf[:, p + kh*wp + kw].
    acc = None
    for kh in range(3):
        for kw in range(3):
            d = kh * wp + kw                               # static shift
            t = kh * 3 + kw
            tap = xbuf_ref[0, :, pl.ds(d, ls)]             # [3, Ls]
            w_t = w1_ref[:, 3 * t:3 * t + 3]               # [32, 3]
            contrib = jnp.dot(w_t, tap, preferred_element_type=jnp.float32)
            acc = contrib if acc is None else acc + contrib
    h1 = jnp.maximum(acc + b1_ref[...], 0.0)               # [32, Ls]
    # 1x1 conv, kept transposed so Ls stays on the 128-lane axis.
    pgT = jnp.dot(w2t_ref[...], h1,
                  preferred_element_type=jnp.float32) + b2t_ref[...]   # [C, Ls]

    # ---- cross-attention with Wk/Wv folded out of the slab ----
    dec = dec_ref[0]                                       # [N, C]
    qk = jnp.dot(dec, wqk_ref[...],
                 preferred_element_type=jnp.float32) + bqk_ref[...]    # [N, C]
    scale = 1.0 / (hidden_dim ** 0.5)
    # mask adds -1e30 at slab positions that are not real pixels (exact).
    s = jnp.dot(qk, pgT, preferred_element_type=jnp.float32) * scale + mask_ref[...]
    s = s - jnp.max(s, axis=-1, keepdims=True)
    p = jnp.exp(s)
    p = p * pl.reciprocal(jnp.sum(p, axis=-1, keepdims=True), approx=False)

    # ctx' = P @ pg, with pg held as pg^T: contract last dims, no transpose.
    ctx = lax.dot_general(p, pgT, (((1,), (1,)), ((), ())),
                          preferred_element_type=jnp.float32)          # [N, C]
    out = jnp.dot(ctx, wvo_ref[...],
                  preferred_element_type=jnp.float32) + bvo_ref[...]   # [N, C]

    # ---- residual + LayerNorm ----
    enh = dec + out
    mean = jnp.mean(enh, axis=-1, keepdims=True)
    var = jnp.mean((enh - mean) ** 2, axis=-1, keepdims=True)
    normed = (enh - mean) * lax.rsqrt(var + 1e-5)
    out_ref[0] = (normed * gamma_ref[...] + beta_ref[...]).astype(out_ref.dtype)


def gradient_enhancer_fused(dec, xbuf, mask_bias, kp, *, wp, ls):
    B, N, C = dec.shape
    _, Cin, P = xbuf.shape
    Cmid, KT = kp["w1_tap"].shape
    full2 = lambda b: (0, 0)
    return pl.pallas_call(
        functools.partial(_fused_kernel, hidden_dim=C, wp=wp, ls=ls),
        out_shape=jax.ShapeDtypeStruct((B, N, C), jnp.float32),
        grid_spec=pltpu.PrefetchScalarGridSpec(
            num_scalar_prefetch=0,
            grid=(B,),
            in_specs=[
                pl.BlockSpec((1, Cin, P), lambda b: (b, 0, 0)),   # padded image slab
                pl.BlockSpec((1, N, C), lambda b: (b, 0, 0)),     # decoder feats
                pl.BlockSpec((1, ls), full2),                     # score mask bias
                pl.BlockSpec((Cmid, KT), full2),                  # conv1 taps [o,(tap,c)]
                pl.BlockSpec((Cmid, 1), full2),                   # conv1 bias
                pl.BlockSpec((C, Cmid), full2),                   # conv2 weight^T
                pl.BlockSpec((C, 1), full2),                      # conv2 bias
                pl.BlockSpec((C, C), full2),                      # Wqk = Wq @ Wk^T
                pl.BlockSpec((1, C), full2),                      # bqk
                pl.BlockSpec((C, C), full2),                      # Wvo = Wv @ Wo
                pl.BlockSpec((1, C), full2),                      # bvo
                pl.BlockSpec((1, C), full2),                      # LN gamma
                pl.BlockSpec((1, C), full2),                      # LN beta
            ],
            out_specs=pl.BlockSpec((1, N, C), lambda b: (b, 0, 0)),
        ),
        compiler_params=pltpu.CompilerParams(
            dimension_semantics=("parallel",)),
    )(xbuf, dec, mask_bias,
      kp["w1_tap"], kp["b1t"], kp["w2t"], kp["b2t"],
      kp["wqk"], kp["bqk"], kp["wvo"], kp["bvo"],
      kp["gamma"], kp["beta"])


# ----------------------------------------------------------------------------
# One-time parameter preparation (hoisted out of the per-step path).
# ----------------------------------------------------------------------------
def prepare_params(params):
    C = params["hidden_dim"]
    # conv1 weight [27=(c,kh,kw), 32] -> tap-major kernel layout [32, 27=(tap,c)]
    w1 = params["w_conv1"].reshape(3, 9, 32)                    # [c, tap, o]
    w1_tap = jnp.transpose(w1, (2, 1, 0)).reshape(32, 27)       # [o, (tap, c)]
    wqk = params["w_q"] @ params["w_k"].T                       # [C, C]
    bqk = params["b_q"] @ params["w_k"].T                       # [1, C] (bk cancels)
    wvo = params["w_v"] @ params["w_o"]                         # [C, C]
    bvo = params["b_v"] @ params["w_o"] + params["b_o"]         # [1, C] (rows of P sum to 1)
    return {
        "hidden_dim": C,
        "w1_tap": w1_tap,
        "b1t": params["b_conv1"].T,      # [32, 1]
        "w2t": params["w_conv2"].T,      # [C, 32]
        "b2t": params["b_conv2"].T,      # [C, 1]
        "wqk": wqk, "bqk": bqk, "wvo": wvo, "bvo": bvo,
        "gamma": params["ln_gamma"], "beta": params["ln_beta"],
    }


# ----------------------------------------------------------------------------
# Full module forward
# ----------------------------------------------------------------------------
def gradient_enhancer_forward(kparams, decoder_features, gradient_features):
    B, Cin, H, W = gradient_features.shape
    Hp, Wp = H + 2, W + 2
    ls = _round_up(H * Wp, 128)                  # key-slab length (covers all pixels)
    d_max = 2 * Wp + 2                           # largest tap shift
    P = _round_up(max(Hp * Wp, d_max + ls), 128)

    # Zero-pad spatially (conv padding=1), flatten row-major, pad the tail so
    # every shifted tap window [d, d+ls) stays in range.  3 tiny XLA ops.
    xp = jnp.pad(gradient_features, ((0, 0), (0, 0), (1, 1), (1, 1)))
    xbuf = jnp.pad(xp.reshape(B, Cin, Hp * Wp), ((0, 0), (0, 0), (0, P - Hp * Wp)))

    # Additive score mask: 0 at real pixels (p = h*Wp + w), -1e30 elsewhere.
    # Constant-foldable under jit; tiny otherwise.
    p_idx = np.arange(ls)
    valid = ((p_idx % Wp) < W) & ((p_idx // Wp) < H)
    mask_bias = jnp.asarray(np.where(valid, 0.0, -1e30),
                            dtype=jnp.float32).reshape(1, ls)

    return gradient_enhancer_fused(decoder_features, xbuf, mask_bias, kparams,
                                   wp=Wp, ls=ls)


# ----------------------------------------------------------------------------
# Pure-JAX reference for correctness checking (im2col form, unfolded weights).
# ----------------------------------------------------------------------------
def im2col_3x3_t(x):
    """x: [B, 3, H, W] -> patches [B, 27, H*W], 27 flattened over (c, kh, kw)."""
    B, Cin, H, W = x.shape
    xp = jnp.pad(x, ((0, 0), (0, 0), (1, 1), (1, 1)))
    taps = []
    for kh in range(3):
        for kw in range(3):
            taps.append(xp[:, :, kh:kh + H, kw:kw + W])           # [B, 3, H, W]
    patches = jnp.stack(taps, axis=2)                             # [B, 3, 9, H, W]
    return patches.reshape(B, Cin * 9, H * W)                     # [B, 27, HW]


def reference_forward(params, decoder_features, gradient_features):
    C = params["hidden_dim"]
    patches = jnp.swapaxes(im2col_3x3_t(gradient_features), 1, 2)  # [B, HW, 27]
    h1 = jnp.maximum(patches @ params["w_conv1"] + params["b_conv1"][0], 0.0)
    pg = h1 @ params["w_conv2"] + params["b_conv2"][0]
    q = decoder_features @ params["w_q"] + params["b_q"][0]
    k = pg @ params["w_k"] + params["b_k"][0]
    v = pg @ params["w_v"] + params["b_v"][0]
    s = jnp.einsum("bnc,bmc->bnm", q, k) / (C ** 0.5)
    p = jax.nn.softmax(s, axis=-1)
    ctx = jnp.einsum("bnm,bmc->bnc", p, v)
    out = ctx @ params["w_o"] + params["b_o"][0]
    enh = decoder_features + out
    mean = jnp.mean(enh, -1, keepdims=True)
    var = jnp.mean((enh - mean) ** 2, -1, keepdims=True)
    return (enh - mean) / jnp.sqrt(var + 1e-5) * params["ln_gamma"][0] + params["ln_beta"][0]


def init_params(key, hidden_dim):
    ks = jax.random.split(key, 8)
    s = 0.05
    return {
        "hidden_dim": hidden_dim,
        # conv1: 3x3, 3->32 as [27, 32] (im2col layout); conv2: 1x1, 32->C as [32, C]
        "w_conv1": jax.random.normal(ks[0], (27, 32), jnp.float32) * s,
        "b_conv1": jax.random.normal(ks[1], (1, 32), jnp.float32) * s,
        "w_conv2": jax.random.normal(ks[2], (32, hidden_dim), jnp.float32) * s,
        "b_conv2": jax.random.normal(ks[3], (1, hidden_dim), jnp.float32) * s,
        # linear layers stored as [in, out]
        "w_q": jax.random.normal(ks[4], (hidden_dim, hidden_dim), jnp.float32) * s,
        "b_q": jnp.zeros((1, hidden_dim), jnp.float32),
        "w_k": jax.random.normal(ks[5], (hidden_dim, hidden_dim), jnp.float32) * s,
        "b_k": jnp.zeros((1, hidden_dim), jnp.float32),
        "w_v": jax.random.normal(ks[6], (hidden_dim, hidden_dim), jnp.float32) * s,
        "b_v": jnp.zeros((1, hidden_dim), jnp.float32),
        "w_o": jax.random.normal(ks[7], (hidden_dim, hidden_dim), jnp.float32) * s,
        "b_o": jnp.zeros((1, hidden_dim), jnp.float32),
        "ln_gamma": jnp.ones((1, hidden_dim), jnp.float32),
        "ln_beta": jnp.zeros((1, hidden_dim), jnp.float32),
    }


if __name__ == "__main__":
    B, N, hidden_dim, H, W = 2, 8, 32, 16, 16

    key = jax.random.PRNGKey(0)
    kparam_key, kd, kg = jax.random.split(key, 3)
    params = init_params(kparam_key, hidden_dim)
    kernel_params = prepare_params(params)            # one-time prep, not per step
    decoder_features = jax.random.normal(kd, (B, N, hidden_dim), jnp.float32)
    gradient_features = jax.random.normal(kg, (B, 3, H, W), jnp.float32)

    out = gradient_enhancer_forward(kernel_params, decoder_features, gradient_features)
    out = jax.block_until_ready(out)

    ref = reference_forward(params, decoder_features, gradient_features)
    assert out.shape == (B, N, hidden_dim)
    assert jnp.allclose(out, ref, atol=1e-4, rtol=1e-4), "mismatch vs reference"

    print("KERNEL_OK")
</pallas_src>

<mosaic_0001>
module attributes {stable_mosaic.version = 11 : i64} {
  func.func @_fused_kernel(%arg0: i32, %arg1: memref<1x3x512xf32, #tpu.memory_space<vmem>>, %arg2: memref<1x8x32xf32, #tpu.memory_space<vmem>>, %arg3: memref<1x384xf32, #tpu.memory_space<vmem>>, %arg4: memref<32x27xf32, #tpu.memory_space<vmem>>, %arg5: memref<32x1xf32, #tpu.memory_space<vmem>>, %arg6: memref<32x32xf32, #tpu.memory_space<vmem>>, %arg7: memref<32x1xf32, #tpu.memory_space<vmem>>, %arg8: memref<32x32xf32, #tpu.memory_space<vmem>>, %arg9: memref<1x32xf32, #tpu.memory_space<vmem>>, %arg10: memref<32x32xf32, #tpu.memory_space<vmem>>, %arg11: memref<1x32xf32, #tpu.memory_space<vmem>>, %arg12: memref<1x32xf32, #tpu.memory_space<vmem>>, %arg13: memref<1x32xf32, #tpu.memory_space<vmem>>, %arg14: memref<1x8x32xf32, #tpu.memory_space<vmem>>) attributes {dimension_semantics = [#tpu.dimension_semantics<parallel>], iteration_bounds = array<i64: 2>, scalar_prefetch = 0 : i64, scratch_operands = 0 : i64, tpu.core_type = #tpu.core_type<tc>, window_params = [{transform_indices = @transform_0, window_bounds = array<i64: 1, 3, 512>}, {transform_indices = @transform_1, window_bounds = array<i64: 1, 8, 32>}, {pipeline_mode = #tpu.pipeline_mode<synchronous>, transform_indices = @transform_2, window_bounds = array<i64: 1, 384>}, {pipeline_mode = #tpu.pipeline_mode<synchronous>, transform_indices = @transform_3, window_bounds = array<i64: 32, 27>}, {pipeline_mode = #tpu.pipeline_mode<synchronous>, transform_indices = @transform_4, window_bounds = array<i64: 32, 1>}, {pipeline_mode = #tpu.pipeline_mode<synchronous>, transform_indices = @transform_5, window_bounds = array<i64: 32, 32>}, {pipeline_mode = #tpu.pipeline_mode<synchronous>, transform_indices = @transform_6, window_bounds = array<i64: 32, 1>}, {pipeline_mode = #tpu.pipeline_mode<synchronous>, transform_indices = @transform_7, window_bounds = array<i64: 32, 32>}, {pipeline_mode = #tpu.pipeline_mode<synchronous>, transform_indices = @transform_8, window_bounds = array<i64: 1, 32>}, {pipeline_mode = #tpu.pipeline_mode<synchronous>, transform_indices = @transform_9, window_bounds = array<i64: 32, 32>}, {pipeline_mode = #tpu.pipeline_mode<synchronous>, transform_indices = @transform_10, window_bounds = array<i64: 1, 32>}, {pipeline_mode = #tpu.pipeline_mode<synchronous>, transform_indices = @transform_11, window_bounds = array<i64: 1, 32>}, {pipeline_mode = #tpu.pipeline_mode<synchronous>, transform_indices = @transform_12, window_bounds = array<i64: 1, 32>}, {transform_indices = @transform_13, window_bounds = array<i64: 1, 8, 32>}]} {
    %c0 = arith.constant 0 : index
    %c0_0 = arith.constant 0 : index
    %c0_1 = arith.constant 0 : index
    %0 = vector.load %arg1[%c0, %c0_0, %c0_1] : memref<1x3x512xf32, #tpu.memory_space<vmem>>, vector<1x3x384xf32>
    %1 = vector.shape_cast %0 : vector<1x3x384xf32> to vector<3x384xf32>
    %c0_2 = arith.constant 0 : index
    %c0_3 = arith.constant 0 : index
    %2 = vector.load %arg4[%c0_2, %c0_3] : memref<32x27xf32, #tpu.memory_space<vmem>>, vector<32x3xf32>
    %cst = arith.constant dense<0.000000e+00> : vector<32x384xf32>
    %3 = tpu.matmul %2, %1, %cst {dimension_numbers = #tpu.dot_dimension_numbers<[1], [0], [0], [1], [0, 0, 1, 1], [], []>} : vector<32x3xf32>, vector<3x384xf32>, vector<32x384xf32> -> vector<32x384xf32>
    %c0_4 = arith.constant 0 : index
    %c0_5 = arith.constant 0 : index
    %c1 = arith.constant 1 : index
    %4 = vector.load %arg1[%c0_4, %c0_5, %c1] : memref<1x3x512xf32, #tpu.memory_space<vmem>>, vector<1x3x384xf32>
    %5 = vector.shape_cast %4 : vector<1x3x384xf32> to vector<3x384xf32>
    %c0_6 = arith.constant 0 : index
    %c3 = arith.constant 3 : index
    %6 = vector.load %arg4[%c0_6, %c3] : memref<32x27xf32, #tpu.memory_space<vmem>>, vector<32x3xf32>
    %cst_7 = arith.constant dense<0.000000e+00> : vector<32x384xf32>
    %7 = tpu.matmul %6, %5, %cst_7 {dimension_numbers = #tpu.dot_dimension_numbers<[1], [0], [0], [1], [0, 0, 1, 1], [], []>} : vector<32x3xf32>, vector<3x384xf32>, vector<32x384xf32> -> vector<32x384xf32>
    %8 = arith.addf %3, %7 : vector<32x384xf32>
    %c0_8 = arith.constant 0 : index
    %c0_9 = arith.constant 0 : index
    %c2 = arith.constant 2 : index
    %9 = vector.load %arg1[%c0_8, %c0_9, %c2] : memref<1x3x512xf32, #tpu.memory_space<vmem>>, vector<1x3x384xf32>
    %10 = vector.shape_cast %9 : vector<1x3x384xf32> to vector<3x384xf32>
    %c0_10 = arith.constant 0 : index
    %c6 = arith.constant 6 : index
    %11 = vector.load %arg4[%c0_10, %c6] : memref<32x27xf32, #tpu.memory_space<vmem>>, vector<32x3xf32>
    %cst_11 = arith.constant dense<0.000000e+00> : vector<32x384xf32>
    %12 = tpu.matmul %11, %10, %cst_11 {dimension_numbers = #tpu.dot_dimension_numbers<[1], [0], [0], [1], [0, 0, 1, 1], [], []>} : vector<32x3xf32>, vector<3x384xf32>, vector<32x384xf32> -> vector<32x384xf32>
    %13 = arith.addf %8, %12 : vector<32x384xf32>
    %c0_12 = arith.constant 0 : index
    %c0_13 = arith.constant 0 : index
    %c18 = arith.constant 18 : index
    %14 = vector.load %arg1[%c0_12, %c0_13, %c18] : memref<1x3x512xf32, #tpu.memory_space<vmem>>, vector<1x3x384xf32>
    %15 = vector.shape_cast %14 : vector<1x3x384xf32> to vector<3x384xf32>
    %c0_14 = arith.constant 0 : index
    %c9 = arith.constant 9 : index
    %16 = vector.load %arg4[%c0_14, %c9] : memref<32x27xf32, #tpu.memory_space<vmem>>, vector<32x3xf32>
    %cst_15 = arith.constant dense<0.000000e+00> : vector<32x384xf32>
    %17 = tpu.matmul %16, %15, %cst_15 {dimension_numbers = #tpu.dot_dimension_numbers<[1], [0], [0], [1], [0, 0, 1, 1], [], []>} : vector<32x3xf32>, vector<3x384xf32>, vector<32x384xf32> -> vector<32x384xf32>
    %18 = arith.addf %13, %17 : vector<32x384xf32>
    %c0_16 = arith.constant 0 : index
    %c0_17 = arith.constant 0 : index
    %c19 = arith.constant 19 : index
    %19 = vector.load %arg1[%c0_16, %c0_17, %c19] : memref<1x3x512xf32, #tpu.memory_space<vmem>>, vector<1x3x384xf32>
    %20 = vector.shape_cast %19 : vector<1x3x384xf32> to vector<3x384xf32>
    %c0_18 = arith.constant 0 : index
    %c12 = arith.constant 12 : index
    %21 = vector.load %arg4[%c0_18, %c12] : memref<32x27xf32, #tpu.memory_space<vmem>>, vector<32x3xf32>
    %cst_19 = arith.constant dense<0.000000e+00> : vector<32x384xf32>
    %22 = tpu.matmul %21, %20, %cst_19 {dimension_numbers = #tpu.dot_dimension_numbers<[1], [0], [0], [1], [0, 0, 1, 1], [], []>} : vector<32x3xf32>, vector<3x384xf32>, vector<32x384xf32> -> vector<32x384xf32>
    %23 = arith.addf %18, %22 : vector<32x384xf32>
    %c0_20 = arith.constant 0 : index
    %c0_21 = arith.constant 0 : index
    %c20 = arith.constant 20 : index
    %24 = vector.load %arg1[%c0_20, %c0_21, %c20] : memref<1x3x512xf32, #tpu.memory_space<vmem>>, vector<1x3x384xf32>
    %25 = vector.shape_cast %24 : vector<1x3x384xf32> to vector<3x384xf32>
    %c0_22 = arith.constant 0 : index
    %c15 = arith.constant 15 : index
    %26 = vector.load %arg4[%c0_22, %c15] : memref<32x27xf32, #tpu.memory_space<vmem>>, vector<32x3xf32>
    %cst_23 = arith.constant dense<0.000000e+00> : vector<32x384xf32>
    %27 = tpu.matmul %26, %25, %cst_23 {dimension_numbers = #tpu.dot_dimension_numbers<[1], [0], [0], [1], [0, 0, 1, 1], [], []>} : vector<32x3xf32>, vector<3x384xf32>, vector<32x384xf32> -> vector<32x384xf32>
    %28 = arith.addf %23, %27 : vector<32x384xf32>
    %c0_24 = arith.constant 0 : index
    %c0_25 = arith.constant 0 : index
    %c36 = arith.constant 36 : index
    %29 = vector.load %arg1[%c0_24, %c0_25, %c36] : memref<1x3x512xf32, #tpu.memory_space<vmem>>, vector<1x3x384xf32>
    %30 = vector.shape_cast %29 : vector<1x3x384xf32> to vector<3x384xf32>
    %c0_26 = arith.constant 0 : index
    %c18_27 = arith.constant 18 : index
    %31 = vector.load %arg4[%c0_26, %c18_27] : memref<32x27xf32, #tpu.memory_space<vmem>>, vector<32x3xf32>
    %cst_28 = arith.constant dense<0.000000e+00> : vector<32x384xf32>
    %32 = tpu.matmul %31, %30, %cst_28 {dimension_numbers = #tpu.dot_dimension_numbers<[1], [0], [0], [1], [0, 0, 1, 1], [], []>} : vector<32x3xf32>, vector<3x384xf32>, vector<32x384xf32> -> vector<32x384xf32>
    %33 = arith.addf %28, %32 : vector<32x384xf32>
    %c0_29 = arith.constant 0 : index
    %c0_30 = arith.constant 0 : index
    %c37 = arith.constant 37 : index
    %34 = vector.load %arg1[%c0_29, %c0_30, %c37] : memref<1x3x512xf32, #tpu.memory_space<vmem>>, vector<1x3x384xf32>
    %35 = vector.shape_cast %34 : vector<1x3x384xf32> to vector<3x384xf32>
    %c0_31 = arith.constant 0 : index
    %c21 = arith.constant 21 : index
    %36 = vector.load %arg4[%c0_31, %c21] : memref<32x27xf32, #tpu.memory_space<vmem>>, vector<32x3xf32>
    %cst_32 = arith.constant dense<0.000000e+00> : vector<32x384xf32>
    %37 = tpu.matmul %36, %35, %cst_32 {dimension_numbers = #tpu.dot_dimension_numbers<[1], [0], [0], [1], [0, 0, 1, 1], [], []>} : vector<32x3xf32>, vector<3x384xf32>, vector<32x384xf32> -> vector<32x384xf32>
    %38 = arith.addf %33, %37 : vector<32x384xf32>
    %c0_33 = arith.constant 0 : index
    %c0_34 = arith.constant 0 : index
    %c38 = arith.constant 38 : index
    %39 = vector.load %arg1[%c0_33, %c0_34, %c38] : memref<1x3x512xf32, #tpu.memory_space<vmem>>, vector<1x3x384xf32>
    %40 = vector.shape_cast %39 : vector<1x3x384xf32> to vector<3x384xf32>
    %c0_35 = arith.constant 0 : index
    %c24 = arith.constant 24 : index
    %41 = vector.load %arg4[%c0_35, %c24] : memref<32x27xf32, #tpu.memory_space<vmem>>, vector<32x3xf32>
    %cst_36 = arith.constant dense<0.000000e+00> : vector<32x384xf32>
    %42 = tpu.matmul %41, %40, %cst_36 {dimension_numbers = #tpu.dot_dimension_numbers<[1], [0], [0], [1], [0, 0, 1, 1], [], []>} : vector<32x3xf32>, vector<3x384xf32>, vector<32x384xf32> -> vector<32x384xf32>
    %43 = arith.addf %38, %42 : vector<32x384xf32>
    %c0_37 = arith.constant 0 : index
    %c0_38 = arith.constant 0 : index
    %44 = vector.load %arg5[%c0_37, %c0_38] : memref<32x1xf32, #tpu.memory_space<vmem>>, vector<32x1xf32>
    %45 = vector.broadcast %44 : vector<32x1xf32> to vector<32x384xf32>
    %46 = arith.addf %43, %45 : vector<32x384xf32>
    %cst_39 = arith.constant 0.000000e+00 : f32
    %47 = vector.broadcast %cst_39 : f32 to vector<32x384xf32>
    %48 = arith.maximumf %46, %47 : vector<32x384xf32>
    %c0_40 = arith.constant 0 : index
    %c0_41 = arith.constant 0 : index
    %49 = vector.load %arg6[%c0_40, %c0_41] : memref<32x32xf32, #tpu.memory_space<vmem>>, vector<32x32xf32>
    %cst_42 = arith.constant dense<0.000000e+00> : vector<32x384xf32>
    %50 = tpu.matmul %49, %48, %cst_42 {dimension_numbers = #tpu.dot_dimension_numbers<[1], [0], [0], [1], [0, 0, 1, 1], [], []>} : vector<32x32xf32>, vector<32x384xf32>, vector<32x384xf32> -> vector<32x384xf32>
    %c0_43 = arith.constant 0 : index
    %c0_44 = arith.constant 0 : index
    %51 = vector.load %arg7[%c0_43, %c0_44] : memref<32x1xf32, #tpu.memory_space<vmem>>, vector<32x1xf32>
    %52 = vector.broadcast %51 : vector<32x1xf32> to vector<32x384xf32>
    %53 = arith.addf %50, %52 : vector<32x384xf32>
    %c0_45 = arith.constant 0 : index
    %c0_46 = arith.constant 0 : index
    %c0_47 = arith.constant 0 : index
    %54 = vector.load %arg2[%c0_45, %c0_46, %c0_47] : memref<1x8x32xf32, #tpu.memory_space<vmem>>, vector<1x8x32xf32>
    %55 = vector.shape_cast %54 : vector<1x8x32xf32> to vector<8x32xf32>
    %c0_48 = arith.constant 0 : index
    %c0_49 = arith.constant 0 : index
    %56 = vector.load %arg8[%c0_48, %c0_49] : memref<32x32xf32, #tpu.memory_space<vmem>>, vector<32x32xf32>
    %cst_50 = arith.constant dense<0.000000e+00> : vector<8x32xf32>
    %57 = tpu.matmul %55, %56, %cst_50 {dimension_numbers = #tpu.dot_dimension_numbers<[1], [0], [0], [1], [0, 0, 1, 1], [], []>} : vector<8x32xf32>, vector<32x32xf32>, vector<8x32xf32> -> vector<8x32xf32>
    %c0_51 = arith.constant 0 : index
    %c0_52 = arith.constant 0 : index
    %58 = vector.load %arg9[%c0_51, %c0_52] : memref<1x32xf32, #tpu.memory_space<vmem>>, vector<1x32xf32>
    %59 = vector.broadcast %58 : vector<1x32xf32> to vector<8x32xf32>
    %60 = arith.addf %57, %59 : vector<8x32xf32>
    %cst_53 = arith.constant dense<0.000000e+00> : vector<8x384xf32>
    %61 = tpu.matmul %60, %53, %cst_53 {dimension_numbers = #tpu.dot_dimension_numbers<[1], [0], [0], [1], [0, 0, 1, 1], [], []>} : vector<8x32xf32>, vector<32x384xf32>, vector<8x384xf32> -> vector<8x384xf32>
    %cst_54 = arith.constant 0.176776692 : f32
    %62 = vector.broadcast %cst_54 : f32 to vector<8x384xf32>
    %63 = arith.mulf %61, %62 : vector<8x384xf32>
    %c0_55 = arith.constant 0 : index
    %c0_56 = arith.constant 0 : index
    %64 = vector.load %arg3[%c0_55, %c0_56] : memref<1x384xf32, #tpu.memory_space<vmem>>, vector<1x384xf32>
    %65 = vector.broadcast %64 : vector<1x384xf32> to vector<8x384xf32>
    %66 = arith.addf %63, %65 : vector<8x384xf32>
    %cst_57 = arith.constant dense<0xFF800000> : vector<8xf32>
    %67 = vector.multi_reduction <maximumf>, %66, %cst_57 [1] : vector<8x384xf32> to vector<8xf32>
    %68 = vector.shape_cast %67 : vector<8xf32> to vector<8x1xf32>
    %69 = vector.broadcast %68 : vector<8x1xf32> to vector<8x384xf32>
    %70 = arith.subf %66, %69 : vector<8x384xf32>
    %71 = math.exp %70 : vector<8x384xf32>
    %cst_58 = arith.constant dense<0.000000e+00> : vector<8xf32>
    %72 = vector.multi_reduction <add>, %71, %cst_58 [1] : vector<8x384xf32> to vector<8xf32>
    %73 = vector.shape_cast %72 : vector<8xf32> to vector<8x1xf32>
    %74 = tpu.reciprocal %73 : vector<8x1xf32> -> vector<8x1xf32>
    %75 = vector.broadcast %74 : vector<8x1xf32> to vector<8x384xf32>
    %76 = arith.mulf %71, %75 : vector<8x384xf32>
    %cst_59 = arith.constant dense<0.000000e+00> : vector<8x32xf32>
    %77 = tpu.matmul %76, %53, %cst_59 {dimension_numbers = #tpu.dot_dimension_numbers<[1], [1], [0], [0], [0, 0, 1, 0], [], []>} : vector<8x384xf32>, vector<32x384xf32>, vector<8x32xf32> -> vector<8x32xf32>
    %c0_60 = arith.constant 0 : index
    %c0_61 = arith.constant 0 : index
    %78 = vector.load %arg10[%c0_60, %c0_61] : memref<32x32xf32, #tpu.memory_space<vmem>>, vector<32x32xf32>
    %cst_62 = arith.constant dense<0.000000e+00> : vector<8x32xf32>
    %79 = tpu.matmul %77, %78, %cst_62 {dimension_numbers = #tpu.dot_dimension_numbers<[1], [0], [0], [1], [0, 0, 1, 1], [], []>} : vector<8x32xf32>, vector<32x32xf32>, vector<8x32xf32> -> vector<8x32xf32>
    %c0_63 = arith.constant 0 : index
    %c0_64 = arith.constant 0 : index
    %80 = vector.load %arg11[%c0_63, %c0_64] : memref<1x32xf32, #tpu.memory_space<vmem>>, vector<1x32xf32>
    %81 = vector.broadcast %80 : vector<1x32xf32> to vector<8x32xf32>
    %82 = arith.addf %79, %81 : vector<8x32xf32>
    %83 = arith.addf %55, %82 : vector<8x32xf32>
    %cst_65 = arith.constant dense<0.000000e+00> : vector<8xf32>
    %84 = vector.multi_reduction <add>, %83, %cst_65 [1] : vector<8x32xf32> to vector<8xf32>
    %85 = vector.shape_cast %84 : vector<8xf32> to vector<8x1xf32>
    %cst_66 = arith.constant 3.200000e+01 : f32
    %86 = vector.broadcast %cst_66 : f32 to vector<8x1xf32>
    %87 = arith.divf %85, %86 : vector<8x1xf32>
    %88 = vector.broadcast %87 : vector<8x1xf32> to vector<8x32xf32>
    %89 = arith.subf %83, %88 : vector<8x32xf32>
    %90 = arith.mulf %89, %89 : vector<8x32xf32>
    %cst_67 = arith.constant dense<0.000000e+00> : vector<8xf32>
    %91 = vector.multi_reduction <add>, %90, %cst_67 [1] : vector<8x32xf32> to vector<8xf32>
    %92 = vector.shape_cast %91 : vector<8xf32> to vector<8x1xf32>
    %cst_68 = arith.constant 3.200000e+01 : f32
    %93 = vector.broadcast %cst_68 : f32 to vector<8x1xf32>
    %94 = arith.divf %92, %93 : vector<8x1xf32>
    %95 = vector.broadcast %87 : vector<8x1xf32> to vector<8x32xf32>
    %96 = arith.subf %83, %95 : vector<8x32xf32>
    %cst_69 = arith.constant 9.99999974E-6 : f32
    %97 = vector.broadcast %cst_69 : f32 to vector<8x1xf32>
    %98 = arith.addf %94, %97 : vector<8x1xf32>
    %99 = math.rsqrt %98 : vector<8x1xf32>
    %100 = vector.broadcast %99 : vector<8x1xf32> to vector<8x32xf32>
    %101 = arith.mulf %96, %100 : vector<8x32xf32>
    %c0_70 = arith.constant 0 : index
    %c0_71 = arith.constant 0 : index
    %102 = vector.load %arg12[%c0_70, %c0_71] : memref<1x32xf32, #tpu.memory_space<vmem>>, vector<1x32xf32>
    %103 = vector.broadcast %102 : vector<1x32xf32> to vector<8x32xf32>
    %104 = arith.mulf %101, %103 : vector<8x32xf32>
    %c0_72 = arith.constant 0 : index
    %c0_73 = arith.constant 0 : index
    %105 = vector.load %arg13[%c0_72, %c0_73] : memref<1x32xf32, #tpu.memory_space<vmem>>, vector<1x32xf32>
    %106 = vector.broadcast %105 : vector<1x32xf32> to vector<8x32xf32>
    %107 = arith.addf %104, %106 : vector<8x32xf32>
    %c0_74 = arith.constant 0 : index
    %c0_75 = arith.constant 0 : index
    %c0_76 = arith.constant 0 : index
    %108 = vector.load %arg14[%c0_74, %c0_75, %c0_76] : memref<1x8x32xf32, #tpu.memory_space<vmem>>, vector<1x8x32xf32>
    %109 = vector.shape_cast %108 : vector<1x8x32xf32> to vector<8x32xf32>
    %110 = vector.shape_cast %107 : vector<8x32xf32> to vector<1x8x32xf32>
    tpu.vector_store %arg14[%c0_74, %c0_75, %c0_76], %110 {strides = array<i32>} : memref<1x8x32xf32, #tpu.memory_space<vmem>>, vector<1x8x32xf32>,
    return
  }
  func.func @transform_0(%arg0: i32) -> (i32, i32, i32) {
    %c0_i32 = arith.constant 0 : i32
    %c0_i32_0 = arith.constant 0 : i32
    %c0_i32_1 = arith.constant 0 : i32
    return %arg0, %c0_i32, %c0_i32_0 : i32, i32, i32
  }
  func.func @transform_1(%arg0: i32) -> (i32, i32, i32) {
    %c0_i32 = arith.constant 0 : i32
    %c0_i32_0 = arith.constant 0 : i32
    %c0_i32_1 = arith.constant 0 : i32
    return %arg0, %c0_i32, %c0_i32_0 : i32, i32, i32
  }
  func.func @transform_2(%arg0: i32) -> (i32, i32) {
    %c0_i32 = arith.constant 0 : i32
    %c0_i32_0 = arith.constant 0 : i32
    %c0_i32_1 = arith.constant 0 : i32
    return %c0_i32, %c0_i32_0 : i32, i32
  }
  func.func @transform_3(%arg0: i32) -> (i32, i32) {
    %c0_i32 = arith.constant 0 : i32
    %c0_i32_0 = arith.constant 0 : i32
    %c0_i32_1 = arith.constant 0 : i32
    return %c0_i32, %c0_i32_0 : i32, i32
  }
  func.func @transform_4(%arg0: i32) -> (i32, i32) {
    %c0_i32 = arith.constant 0 : i32
    %c0_i32_0 = arith.constant 0 : i32
    %c0_i32_1 = arith.constant 0 : i32
    return %c0_i32, %c0_i32_0 : i32, i32
  }
  func.func @transform_5(%arg0: i32) -> (i32, i32) {
    %c0_i32 = arith.constant 0 : i32
    %c0_i32_0 = arith.constant 0 : i32
    %c0_i32_1 = arith.constant 0 : i32
    return %c0_i32, %c0_i32_0 : i32, i32
  }
  func.func @transform_6(%arg0: i32) -> (i32, i32) {
    %c0_i32 = arith.constant 0 : i32
    %c0_i32_0 = arith.constant 0 : i32
    %c0_i32_1 = arith.constant 0 : i32
    return %c0_i32, %c0_i32_0 : i32, i32
  }
  func.func @transform_7(%arg0: i32) -> (i32, i32) {
    %c0_i32 = arith.constant 0 : i32
    %c0_i32_0 = arith.constant 0 : i32
    %c0_i32_1 = arith.constant 0 : i32
    return %c0_i32, %c0_i32_0 : i32, i32
  }
  func.func @transform_8(%arg0: i32) -> (i32, i32) {
    %c0_i32 = arith.constant 0 : i32
    %c0_i32_0 = arith.constant 0 : i32
    %c0_i32_1 = arith.constant 0 : i32
    return %c0_i32, %c0_i32_0 : i32, i32
  }
  func.func @transform_9(%arg0: i32) -> (i32, i32) {
    %c0_i32 = arith.constant 0 : i32
    %c0_i32_0 = arith.constant 0 : i32
    %c0_i32_1 = arith.constant 0 : i32
    return %c0_i32, %c0_i32_0 : i32, i32
  }
  func.func @transform_10(%arg0: i32) -> (i32, i32) {
    %c0_i32 = arith.constant 0 : i32
    %c0_i32_0 = arith.constant 0 : i32
    %c0_i32_1 = arith.constant 0 : i32
    return %c0_i32, %c0_i32_0 : i32, i32
  }
  func.func @transform_11(%arg0: i32) -> (i32, i32) {
    %c0_i32 = arith.constant 0 : i32
    %c0_i32_0 = arith.constant 0 : i32
    %c0_i32_1 = arith.constant 0 : i32
    return %c0_i32, %c0_i32_0 : i32, i32
  }
  func.func @transform_12(%arg0: i32) -> (i32, i32) {
    %c0_i32 = arith.constant 0 : i32
    %c0_i32_0 = arith.constant 0 : i32
    %c0_i32_1 = arith.constant 0 : i32
    return %c0_i32, %c0_i32_0 : i32, i32
  }
  func.func @transform_13(%arg0: i32) -> (i32, i32, i32) {
    %c0_i32 = arith.constant 0 : i32
    %c0_i32_0 = arith.constant 0 : i32
    %c0_i32_1 = arith.constant 0 : i32
    return %arg0, %c0_i32, %c0_i32_0 : i32, i32, i32
  }
}

</mosaic_0001>

<bundles_post_ra>
// kernel: tpu_custom_call.1
= control target key start
LH: loop header
LB: loop body
LE: loop exit
PB: predicated region body
PF: predicated region fallthrough
CT: control target
= control target key end

     0   :  { %s5004_s0 = inlined_call_operand.vmem [shape: f32[2,3,512], index: 0, kind: input, shape index: {}]   ;;  %s5005_s1 = inlined_call_operand.hbm [shape: f32[2,8,32], index: 1, kind: input, shape index: {}]   ;;  %s5006_s2 = inlined_call_operand.hbm [shape: f32[1,384], index: 2, kind: input, shape index: {}]   ;;  %s5007_s3 = inlined_call_operand.vmem [shape: f32[32,27], index: 3, kind: input, shape index: {}]   ;;  %s5008_s4 = inlined_call_operand.vmem [shape: f32[32,1], index: 4, kind: input, shape index: {}]   ;;  %s5009_s5 = inlined_call_operand.vmem [shape: f32[32,32], index: 5, kind: input, shape index: {}]   ;;  %s5010_s6 = inlined_call_operand.vmem [shape: f32[32,1], index: 6, kind: input, shape index: {}]   ;;  %s5011_s7 = inlined_call_operand.vmem [shape: f32[32,32], index: 7, kind: input, shape index: {}]   ;;  %s5012_s8 = inlined_call_operand.vmem [shape: f32[1,32], index: 8, kind: input, shape index: {}]   ;;  %s5013_s9 = inlined_call_operand.vmem [shape: f32[32,32], index: 9, kind: input, shape index: {}]   ;;  %s5014_s10 = inlined_call_operand.vmem [shape: f32[1,32], index: 10, kind: input, shape index: {}]   ;;  %s5015_s11 = inlined_call_operand.vmem [shape: f32[1,32], index: 11, kind: input, shape index: {}]   ;;  %s5016_s12 = inlined_call_operand.vmem [shape: f32[1,32], index: 12, kind: input, shape index: {}]   ;;  %s5017_s13 = inlined_call_operand.hbm [shape: f32[2,8,32], index: 13, kind: output, shape index: {}]  }
   0x1   :  { %5026 = sst [smem:[#allocation14_spill]] %s5004_s0 }
   0x2   :  { %5027 = sst [smem:[#allocation15_spill]] %s5006_s2 }
   0x3   :  { %5028 = sst [smem:[#allocation16_spill]] %s5017_s13 }
   0x4   :  { %18 = vsyncpa [#allocation3], 0 }
   0x5   :  { %20 = vsyncpa [#allocation3 + $0x1], 0 }
   0x6   :  { %21 = vsyncpa [#allocation6], 0 }
   0x7   :  { %22 = vsyncpa [#allocation4], 0 }
   0x8   :  { %24 = vsyncpa [#allocation4 + $0x1], 0  ;;  %s4254_s25 = smov 0   ;;  %s4256_s26 = smov 0  }
   0x9   :  { %s4258_s27 = smov 0   ;;  %s4260_s28 = smov 0  }
   0xa LB: > { %5029 = sst [smem:[#allocation11_spill]] %s4148_s25  ;;  %s4275_s29 = sadd.s32 4294967295, %s4160_s28   ;;  %s4160_s28 = sphi %s4260_s28, %s5055_s28   ;;  %s4156_s27 = sphi %s4258_s27, %s5058_s27   ;;  %s4152_s26 = sphi %s4256_s26, %s5057_s26   ;;  %s4148_s25 = sphi %s4254_s25, %s5056_s25  }
   0xb   : > { %s3439_s30 = sadd.s32 4294967294, %s4160_s28   ;;  %p76_p0 = scmp.ne.s32.totalorder %s4152_s26, %s4148_s25 }
   0xc   : > { %p5023_p1 = scmp.eq.s32.totalorder %s4275_s29, 0  ;;  %p337_p3 = scmp.eq.s32.totalorder %s3439_s30, 1 }
   0xd   : > { %p3440_p5 = scmp.ge.s32.totalorder %s4160_s28, 1  ;;  %p344_p7 = scmp.lt.s32.totalorder %s4160_s28, 3 }
   0xe   : > { %p4284_p4 = por %p5023_p1, %p76_p0  ;;  %p4289_p6 = por %p337_p3, %p76_p0 }
   0xf   : > { %p4294_p8 = pnand %p3440_p5, %p344_p7  ;;  %s4162_s17 = smov [#allocation5]  }
  0x10   : > { %s5030_s14 = scalar_select %p4284_p4, 1, 0 }
  0x11   : > { %s5031_s15 = scalar_select %p4289_p6, 1, 0 }
  0x12   : > { %s5033_s16 = scalar_select %p4294_p8, 1, 0 }
  0x13   : > { %5032 = sst [smem:[#allocation12_spill]] %s5031_s15  ;;  %s357_s18 = sshll.u32 %s4162_s17, 4  ;;  %s358_s18 = int_to_ptr.vmem [resolvable:$true] %s357_s18 }
  0x14   : > { %p3936_p10 = pneg %p4294_p8  ;;  %s4302_s19 = sadd.s32 1, %s4160_s28  }
  0x15   : > { %5034 = sst [smem:[#allocation13_spill]] %s4302_s19  ;;  %s60_s21 = ssub.s32 %s4160_s28, %s4302_s19 }
  0x16   : > { %p4306_p11 = pnand %p3936_p10, %p5023_p1  ;;  %p4312_p12 = scmp.eq.s32.totalorder %s60_s21, 0 }
  0x17   : > { %s63_s23 = sadd.s32 1, %s4156_s27  ;;  %s5037_s2 = sld [smem:[#allocation15_spill]] }
  0x18   : > { %s5036_s22 = scalar_select %p4312_p12, 1, 0 }
  0x19   : > { %p4034_p3 = pneg %p4306_p11 }
  0x1d   : > { %s4032_s17 = scalar_lea.hbm %s5037_s2, 48 }
  0x1e   : > { %p4033_p0 = scmp.ne.s32.totalorder %s5037_s2, %s4032_s17  ;;  %p4039_p10 = scmp.lt.u32.totalorder %s4032_s17, %s5037_s2 }
  0x20   : > { %p4035_p5 = pnand %p4034_p3, %p4033_p0 }
  0x22   : > { %p4036_p7 = pneg %p4035_p5 }
  0x24   : > { %p4041_p9 = pnand %p4039_p10, %p4036_p7 }
  0x26   : > { %4044 = shalt.err (!%p4041_p9)
}
  0x27   : > { %s4045_s21 = scalar_lea.vmem %s358_s18, 48  ;;  %s4052_s24 = scalar_lea.vmem %s358_s18, 64 }
  0x28   : > { %p4046_p1 = scmp.ne.s32.totalorder %s358_s18, %s4045_s21  ;;  %p4053_p6 = scmp.lt.s32.totalorder %s358_s18, %s358_s18 }
  0x29   : > { %p4054_p4 = scmp.lt.s32.totalorder %s4052_s24, %s4045_s21 }
  0x2a   : > { %p4048_p2 = pnand %p4046_p1, %p4034_p3 }
  0x2b   : > { %p4055_p8 = por %p4054_p4, %p4053_p6 }
  0x2c   : > { %p4049_p13 = pneg %p4048_p2 }
  0x2e   : > { %p4056_p12 = pnand %p4055_p8, %p4049_p13 }
  0x30   : > { %4059 = shalt.err (!%p4056_p12)
}
  0x31   : > { %3939 = dma.hbm_to_vmem [thread:$0]  (!%p4306_p11), %s5037_s2, 48, %s358_s18, [#allocation6]  }
  0x32   : > { %p5038_p1 = scmp.ne.s32.totalorder %s5036_s22, 0  ;;  %p71_p2 = scmp.eq.s32.totalorder %s4160_s28, 0 }
  0x33   : > { %p5039_p4 = scmp.ne.s32.totalorder %s4156_s27, %s4152_s26  ;;  %p5040_p6 = scmp.eq.s32.totalorder %s4275_s29, 1 }
  0x34   : > { %s4338_s13 = scalar_select %p5038_p1, %s4156_s27, %s63_s23  }
  0x35   : > { %p4346_p8 = por %p5040_p6, %p5039_p4  ;;  %p3949_p9 = scmp.lt.s32.totalorder %s4160_s28, 2 }
  0x36   : > { %s406_s20 = sand.u32 1, %s4156_s27   ;;  %p5042_p12 = pmov %p5039_p4 }
  0x37   : > { %s3443_s30 = sshll.u32 %s406_s20, 3  ;;  %s3444_s17 = sshll.u32 %s4160_s28, 7 }
  0x38   : > { %p72_p13 = por %p71_p2, %p5042_p12  ;;  %s4359_s18 = scalar_lea.hbm %s5005_s1, %s3444_s17 }
  0x39   : > { %s410_s22 = scalar_lea.vmem [#allocation2], %s3443_s30  ;;  %s407_s15 = scalar_lea.sflag [#allocation3], %s406_s20 }
  0x3a   : > { %s417_s23 = sshll.u32 %s410_s22, 4  ;;  %p4361_p11 = pnand %p3949_p9, %p72_p13  ;;  %s4365_s23 = int_to_ptr.vmem [resolvable:$true] %s417_s23 }
  0x3b   : > { %s4060_s2 = scalar_lea.hbm %s4359_s18, 128  ;;  %s4065_s21 = scalar_lea.hbm %s5005_s1, 256 }
  0x3c   : > { %p4061_p0 = scmp.ne.s32.totalorder %s4359_s18, %s4060_s2  ;;  %p4062_p3 = pneg %p4361_p11 }
  0x3d   : > { %p4066_p10 = scmp.lt.u32.totalorder %s4359_s18, %s5005_s1  ;;  %p4067_p1 = scmp.lt.u32.totalorder %s4065_s21, %s4060_s2 }
  0x3e   : > { %p4063_p5 = pnand %p4062_p3, %p4061_p0  ;;  %p4069_p4 = scmp.lt.u32.totalorder %s4060_s2, %s4359_s18 }
  0x3f   : > { %p4068_p2 = por %p4067_p1, %p4066_p10 }
  0x40   : > { %p4064_p7 = pneg %p4063_p5 }
  0x41   : > { %p4070_p6 = por %p4069_p4, %p4068_p2 }
  0x43   : > { %p4071_p9 = pnand %p4070_p6, %p4064_p7 }
  0x45   : > { %4074 = shalt.err (!%p4071_p9)
}
  0x46   : > { %s4075_s20 = scalar_lea.vmem %s4365_s23, 128  ;;  %s4163_s17 = smov [#allocation2]  }
  0x47   : > { %p4076_p12 = scmp.ne.s32.totalorder %s4365_s23, %s4075_s20  ;;  %s4080_s30 = sshll.u32 %s4163_s17, 4  ;;  %s4081_s30 = int_to_ptr.vmem [resolvable:$false] %s4080_s30 }
  0x48   : > { %s4082_s24 = scalar_lea.vmem %s4081_s30, 256  ;;  %p4083_p5 = scmp.lt.s32.totalorder %s4365_s23, %s4081_s30 }
  0x49   : > { %p4078_p13 = pnand %p4076_p12, %p4062_p3  ;;  %p4084_p10 = scmp.lt.s32.totalorder %s4082_s24, %s4075_s20 }
  0x4b   : > { %p4079_p0 = pneg %p4078_p13  ;;  %p4085_p1 = por %p4084_p10, %p4083_p5 }
  0x4d   : > { %p4086_p2 = pnand %p4085_p1, %p4079_p0 }
  0x4f   : > { %4089 = shalt.err (!%p4086_p2)
}
  0x50   : > { %3943 = dma.hbm_to_vmem [thread:$0]  (!%p4361_p11), %s4359_s18, 128, %s4365_s23, %s407_s15  }
  0x51   : > { %p5044_p7 = scmp.ne.s32.totalorder %s5033_s16, 0 }
  0x52   : > { %s4395_s2 = sand.u32 (!%p5044_p7), 1, %s4152_s26   ;;  %p5045_p3 = scmp.ne.s32.totalorder (!%p5044_p7), %s5030_s14, 0 }
  0x53   : > { %426 = sbr.rel (%p5044_p7) target bundleno = 2143 (0x85f), region = 72  ;;  %s3446_s21 = sshll.u32 (!%p5044_p7), %s4395_s2, 3 }
  0x54   : > { %s429_s22 = scalar_lea.sflag (!%p5044_p7), [#allocation3], %s4395_s2  ;;  %s4401_s20 = scalar_lea.vmem (!%p5044_p7), [#allocation2], %s3446_s21 }
  0x5a   : > { %4135 = dma.done.wait (%p5045_p3), %s429_s22, 128  }
  0x5b   : > { %4137 = vsyncadd (%p5045_p3), %s429_s22, 4294967168  ;;  %p5046_p11 = scmp.eq.s32.totalorder %s4275_s29, 0 }
  0x5d   : > { %4139 = dma.done.wait (%p5046_p11), [#allocation6], 48   ;;  %p5047_p4 = pmov %p5046_p11 }
  0x5e   : > { %p484_p6 = scmp.lt.s32.totalorder %s4275_s29, 1  ;;  %v4164_v0 = vmov 0.0   ;;  %s5048_s0 = sld [smem:[#allocation14_spill]]  ;;  %v4431_v3 = vld [vmem:[%s5007_s3] sm:$0xff]  ;;  %v4440_v5 = vld [vmem:[%s5007_s3 + $0x10] sm:$0xff]  ;;  %v4447_v7 = vld [vmem:[%s5007_s3 + $0x8] sm:$0xff] }
  0x5f   : > { %4141 = vsyncadd (%p5047_p4), [#allocation6], 4294967248  ;;  %604 = vmatprep.mubr.f32.mxu0 %v4164_v0  ;;  %s4165_s14 = smov 127   ;;  %s4166_s24 = smov 125   ;;  %v4454_v9 = vld [vmem:[%s5007_s3 + $0x18] sm:$0xff]  ;;  %vm524_vm0 = vcmask 23552  }
  0x60   : > { %s485_s16 = scalar_select %p484_p6, %s4275_s29, 1  ;;  %vm520_vm1 = vcmask 1039360   ;;  %vm533_vm2 = vcmask 1042432   ;;  %vm933_vm3 = vcmask 1031168   ;;  %v2542_v52 = vld [vmem:[%s5008_s4 + $0x8] sm:$0xff]  ;;  %v2541_v53 = vld [vmem:[%s5008_s4] sm:$0xff] }
  0x61   : > { %s4167_s30 = smov 126   ;;  %s4168_s22 = smov 122   ;;  %v4180_v56 = vmov 0   ;;  %v2543_v58 = vld [vmem:[%s5008_s4 + $0x10] sm:$0xff]  ;;  %v2544_v59 = vld [vmem:[%s5008_s4 + $0x18] sm:$0xff]  ;;  %vm1167_vm4 = vcmask 900096  }
  0x62   : > { %s3570_s18 = sshll.u32 %s485_s16, 4  ;;  %s4170_s16 = smov 119   ;;  %4005 = vset.pattern.permute.xlu1 %v4180_v56  ;;  %4004 = vset.pattern.permute.xlu0 %v4180_v56  ;;  %v2593_v62 = vld [vmem:[%s5010_s6] sm:$0xff]  ;;  %v2594_v63 = vld [vmem:[%s5010_s6 + $0x8] sm:$0xff]  ;;  %vm1401_vm5 = vcmask 891904   ;;  %vm1635_vm6 = vcmask 883712  }
  0x63   : > { %s4172_s23 = smov 116   ;;  %s4173_s25 = smov 108   ;;  %vm1869_vm7 = vcmask 752640   ;;  %vm2103_vm8 = vcmask 744448   ;;  %vm2337_vm9 = vcmask 736256   ;;  %vm4182_vm10 = vmmov 0  }
  0x64   : > { %s4417_s15 = scalar_lea.vmem %s5048_s0, %s3570_s18  ;;  %s4171_s18 = smov 109   ;;  %vm2617_vm11 = vcmask 261120  }
  0x65   : > { %v4420_v1 = vld [vmem:[%s4417_s15] sm:$0x77]  ;;  %v495_v4 = vld [vmem:[%s4417_s15 + $0x8] sm:$0x77]  ;;  %s4174_s17 = smov 113  }
  0x66   : > { %512 = vrot.lane.b32.xlu1 %v4420_v1, %s4165_s14  ;;  %v4426_v2 = vcombine.high %v4420_v1, %v4420_v1  ;;  %v903_v6 = vld [vmem:[%s4417_s15] sm:$0x77]  ;;  %v904_v10 = vld [vmem:[%s4417_s15 + $0x8] sm:$0x77]  ;;  %v511_v20 = vcombine.high %v495_v4, %v495_v4 }
  0x67   : > { %v923_v8 = vcombine.high %v903_v6, %v903_v6  ;;  %v1137_v11 = vld [vmem:[%s4417_s15] sm:$0x77]  ;;  %v1138_v12 = vld [vmem:[%s4417_s15 + $0x8] sm:$0x77]  ;;  %v924_v24 = vcombine.high %v904_v10, %v904_v10 }
  0x68   : > { %514 = vrot.lane.b32.xlu0 %v4426_v2, %s4165_s14  ;;  %v1157_v13 = vcombine.high %v1137_v11, %v1137_v11  ;;  %v1371_v14 = vld [vmem:[%s4417_s15] sm:$0x77]  ;;  %v1372_v16 = vld [vmem:[%s4417_s15 + $0x8] sm:$0x77]  ;;  %v1158_v27 = vcombine.high %v1138_v12, %v1138_v12 }
  0x69   : > { %v1391_v15 = vcombine.high %v1371_v14, %v1371_v14  ;;  %v1605_v17 = vld [vmem:[%s4417_s15] sm:$0x77]  ;;  %v1606_v18 = vld [vmem:[%s4417_s15 + $0x8] sm:$0x77]  ;;  %v1392_v29 = vcombine.high %v1372_v16, %v1372_v16 }
  0x6a   : > { %500 = vrot.lane.b32.xlu1 %v4431_v3, %s4166_s24  ;;  %v1625_v19 = vcombine.high %v1605_v17, %v1605_v17  ;;  %v1839_v21 = vld [vmem:[%s4417_s15] sm:$0x77]  ;;  %v1840_v22 = vld [vmem:[%s4417_s15 + $0x8] sm:$0x77]  ;;  %v1626_v30 = vcombine.high %v1606_v18, %v1606_v18 }
  0x6b   : > { %v1859_v23 = vcombine.high %v1839_v21, %v1839_v21  ;;  %v2073_v25 = vld [vmem:[%s4417_s15] sm:$0x77]  ;;  %v2074_v28 = vld [vmem:[%s4417_s15 + $0x8] sm:$0x77]  ;;  %v1860_v34 = vcombine.high %v1840_v22, %v1840_v22 }
  0x6c   : > { %516 = vrot.lane.b32.xlu0 %v495_v4, %s4165_s14  ;;  %v2093_v26 = vcombine.high %v2073_v25, %v2073_v25  ;;  %v2307_v31 = vld [vmem:[%s4417_s15] sm:$0x77]  ;;  %v2308_v32 = vld [vmem:[%s4417_s15 + $0x8] sm:$0x77]  ;;  %v2094_v41 = vcombine.high %v2074_v28, %v2074_v28 }
  0x6d   : > { %v2327_v33 = vcombine.high %v2307_v31, %v2307_v31  ;;  %v2328_v38 = vcombine.high %v2308_v32, %v2308_v32 }
  0x6e   : > { %504 = vrot.lane.b32.xlu1 %v4440_v5, %s4166_s24 }
  0x70   : > { %502 = vrot.lane.b32.xlu0 %v4447_v7, %s4166_s24 }
  0x72   : > { %927 = vrot.lane.b32.xlu1 %v923_v8, %s4167_s30  ;;  %v2596_v8 = vld [vmem:[%s5010_s6 + $0x18] sm:$0xff] }
  0x74   : > { %506 = vrot.lane.b32.xlu0 %v4454_v9, %s4166_s24  ;;  %s4169_s24 = smov 110  }
  0x76   : > { %925 = vrot.lane.b32.xlu1 %v903_v6, %s4167_s30  ;;  %v2595_v6 = vld [vmem:[%s5010_s6 + $0x10] sm:$0xff] }
  0x78   : > { %929 = vrot.lane.b32.xlu0 %v904_v10, %s4167_s30 }
  0x7a   : > { %915 = vrot.lane.b32.xlu1 %v4447_v7, %s4168_s22 }
  0x7c   : > { %913 = vrot.lane.b32.xlu0 %v4431_v3, %s4168_s22 }
  0x7e   : > { %919 = vrot.lane.b32.xlu1 %v4454_v9, %s4168_s22 }
  0x80   : > { %917 = vrot.lane.b32.xlu0 %v4440_v5, %s4168_s22  ;;  %s4175_s22 = smov 92  }
  0x82   : > { %1163 = vrot.lane.b32.xlu1 %v1138_v12, %s4169_s24 }
  0x84   : > { %1161 = vrot.lane.b32.xlu0 %v1157_v13, %s4169_s24 }
  0x86   : > { %1147 = vrot.lane.b32.xlu1 %v4431_v3, %s4170_s16 }
  0x88   : > { %1159 = vrot.lane.b32.xlu0 %v1137_v11, %s4169_s24 }
  0x8a   : > { %1151 = vrot.lane.b32.xlu1 %v4440_v5, %s4170_s16 }
  0x8c   : > { %1149 = vrot.lane.b32.xlu0 %v4447_v7, %s4170_s16 }
  0x8e   : > { %1395 = vrot.lane.b32.xlu1 %v1391_v15, %s4171_s18 }
  0x90   : > { %1153 = vrot.lane.b32.xlu0 %v4454_v9, %s4170_s16  ;;  %s4179_s16 = smov 104  }
  0x92   : > { %1393 = vrot.lane.b32.xlu1 %v1371_v14, %s4171_s18 }
  0x94   : > { %1397 = vrot.lane.b32.xlu0 %v1372_v16, %s4171_s18 }
  0x96   : > { %1383 = vrot.lane.b32.xlu1 %v4447_v7, %s4172_s23 }
  0x98   : > { %1381 = vrot.lane.b32.xlu0 %v4431_v3, %s4172_s23 }
  0x9a   : > { %1387 = vrot.lane.b32.xlu1 %v4454_v9, %s4172_s23 }
  0x9c   : > { %1385 = vrot.lane.b32.xlu0 %v4440_v5, %s4172_s23 }
  0x9e   : > { %1631 = vrot.lane.b32.xlu1 %v1606_v18, %s4173_s25 }
  0xa0   : > { %1629 = vrot.lane.b32.xlu0 %v1625_v19, %s4173_s25 }
  0xa2   : > { %1615 = vrot.lane.b32.xlu1 %v4431_v3, %s4174_s17 }
  0xa4   : > { %1627 = vrot.lane.b32.xlu0 %v1605_v17, %s4173_s25 }
  0xa6   : > { %518 = vrot.lane.b32.xlu1 %v511_v20, %s4165_s14  ;;  %s4176_s14 = smov 91  }
  0xa8   : > { %1617 = vrot.lane.b32.xlu0 %v4447_v7, %s4174_s17 }
  0xaa   : > { %1621 = vrot.lane.b32.xlu1 %v4454_v9, %s4174_s17 }
  0xac   : > { %1619 = vrot.lane.b32.xlu0 %v4440_v5, %s4174_s17  ;;  %s3334_s17 = scalar_lea.sflag [#allocation4], %s4395_s2 }
  0xae   : > { %1865 = vrot.lane.b32.xlu1 %v1840_v22, %s4175_s22 }
  0xb0   : > { %1863 = vrot.lane.b32.xlu0 %v1859_v23, %s4175_s22 }
  0xb2   : > { %1849 = vrot.lane.b32.xlu1 %v4431_v3, %s4169_s24 }
  0xb4   : > { %1861 = vrot.lane.b32.xlu0 %v1839_v21, %s4175_s22 }
  0xb6   : > { %931 = vrot.lane.b32.xlu1 %v924_v24, %s4167_s30  ;;  %s4177_s30 = smov 107  }
  0xb8   : > { %1851 = vrot.lane.b32.xlu0 %v4447_v7, %s4169_s24 }
  0xba   : > { %1855 = vrot.lane.b32.xlu1 %v4454_v9, %s4169_s24 }
  0xbc   : > { %1853 = vrot.lane.b32.xlu0 %v4440_v5, %s4169_s24 }
  0xbe   : > { %2097 = vrot.lane.b32.xlu1 %v2093_v26, %s4176_s14 }
  0xc0   : > { %1165 = vrot.lane.b32.xlu0 %v1158_v27, %s4169_s24  ;;  %s4178_s24 = smov 90  }
  0xc2   : > { %2095 = vrot.lane.b32.xlu1 %v2073_v25, %s4176_s14 }
  0xc4   : > { %2099 = vrot.lane.b32.xlu0 %v2074_v28, %s4176_s14 }
  0xc6   : > { %2085 = vrot.lane.b32.xlu1 %v4447_v7, %s4177_s30 }
  0xc8   : > { %2083 = vrot.lane.b32.xlu0 %v4431_v3, %s4177_s30 }
  0xca   : > { %2087 = vrot.lane.b32.xlu1 %v4440_v5, %s4177_s30 }
  0xcc   : > { %1399 = vrot.lane.b32.xlu0 %v1392_v29, %s4171_s18 }
  0xce   : > { %1633 = vrot.lane.b32.xlu1 %v1626_v30, %s4173_s25  ;;  %v490_v30 = vld [vmem:[%s4417_s15 + $0x8] sm:$0x7]  ;;  %s3567_s15 = sshll.u32 %s4275_s29, 7  ;;  %s5049_s25 = sld [smem:[#allocation16_spill]] }
  0xcf   : > { %s4183_s29 = smov [#allocation7]  }
  0xd0   : > { %2089 = vrot.lane.b32.xlu0 %v4454_v9, %s4177_s30 }
  0xd2   : > { %2333 = vrot.lane.b32.xlu1 %v2308_v32, %s4178_s24 }
  0xd4   : > { %2331 = vrot.lane.b32.xlu0 %v2327_v33, %s4178_s24  ;;  %s4959_s0 = scalar_lea.hbm %s5049_s25, %s3567_s15 }
  0xd6   : > { %2317 = vrot.lane.b32.xlu1 %v4431_v3, %s4179_s16 }
  0xd8   : > { %v513_v35 = vpop.permute.xlu1 %512  ;;  %2329 = vrot.lane.b32.xlu0 %v2307_v31, %s4178_s24 }
  0xda   : > { %1867 = vrot.lane.b32.xlu1 %v1860_v34, %s4175_s22  ;;  %v515_v36 = vpop.permute.xlu0 %514 }
  0xdb   : > { %v521_v43 = vsel %vm520_vm1, %v513_v35, %v515_v36 }
  0xdc   : > { %v501_v37 = vpop.permute.xlu1 %500  ;;  %2319 = vrot.lane.b32.xlu0 %v4447_v7, %s4179_s16 }
  0xdd   : > { %3646 = vmatprep.mubr.msk.f32.mxu1 %vm524_vm0, %v501_v37 }
  0xde   : > { %2323 = vrot.lane.b32.xlu1 %v4454_v9, %s4179_s16  ;;  %v4526_v39 = vpop.permute.xlu0 %516 }
  0xdf   : > { %v522_v40 = vsel %vm520_vm1, %v515_v36, %v4526_v39 }
  0xe0   : > { %v4530_v42 = vpop.permute.xlu1 %504  ;;  %2321 = vrot.lane.b32.xlu0 %v4440_v5, %s4179_s16  ;;  %3451 = vmatprep.subr.msk.mxu0 %vm533_vm2, %v522_v40 }
  0xe1   : > { %3452 = vmatpush1.msk.msra.mxu0 %vm533_vm2, %v521_v43 }
  0xe2   : > { %2335 = vrot.lane.b32.xlu1 %v2328_v38, %s4178_s24  ;;  %3453 = vmatmul.mubr.msk.f32.vlgmr.msra.gmra.mrb[0].mxu0 %vm524_vm0, %v501_v37  ;;  %v4537_v44 = vpop.permute.xlu0 %502  ;;  %s483_s24 = scalar_lea.vmem [#allocation7], %s3446_s21  ;;  %s4094_s21 = sshll.u32 %s4183_s29, 4  ;;  %s4095_s21 = int_to_ptr.vmem [resolvable:$false] %s4094_s21 }
  0xe3   : > { %3462 = vmatprep.subr.msk.mxu0 %vm533_vm2, %v4426_v2  ;;  %610 = vmatprep.mubr.f32.mxu0 %v4164_v0  ;;  %s3347_s16 = sshll.u32 %s483_s24, 4  ;;  %s4961_s16 = int_to_ptr.vmem [resolvable:$true] %s3347_s16 }
  0xe4   : > { %3463 = vmatpush1.msk.msra.mxu0 %vm533_vm2, %v4420_v1  ;;  %v928_v45 = vpop.permute.xlu1 %927  ;;  %2101 = vrot.lane.b32.xlu0 %v2094_v41, %s4176_s14  ;;  %s4090_s22 = scalar_lea.vmem %s4961_s16, 128  ;;  %s4096_s14 = scalar_lea.vmem %s4095_s21, 256 }
  0xe5   : > { %p4091_p9 = scmp.ne.s32.totalorder %s4961_s16, %s4090_s22  ;;  %p4097_p0 = scmp.lt.s32.totalorder %s4961_s16, %s4095_s21 }
  0xe6   : > { %3454 = vmatmul.mubr.msk.f32.gmra.mrb[2].mxu0 %vm524_vm0, %v4537_v44  ;;  %v4547_v46 = vpop.permute.xlu0 %506  ;;  %2552 = vperm.xlu1 %4005, %v2542_v52   ;;  %p4098_p5 = scmp.lt.s32.totalorder %s4096_s14, %s4090_s22 }
  0xe7   : > { %616 = vmatprep.mubr.f32.mxu0 %v4164_v0  ;;  %p4092_p12 = pnand %p4091_p9, %p4346_p8 }
  0xe8   : > { %v926_v47 = vpop.permute.xlu1 %925  ;;  %2547 = vperm.xlu0 %4004, %v2541_v53   ;;  %p4099_p10 = por %p4098_p5, %p4097_p0 }
  0xe9   : > { %v934_v54 = vsel %vm933_vm3, %v926_v47, %v928_v45  ;;  %p4093_p13 = pneg %p4092_p12 }
  0xea   : > { %3455 = vmatmul.mubr.msk.f32.gmra.mrb[4].mxu0 %vm524_vm0, %v4530_v42  ;;  %v4552_v48 = vpop.permute.xlu0 %929  ;;  %2557 = vperm.xlu1 %4005, %v2543_v58  }
  0xeb   : > { %v935_v49 = vsel %vm933_vm3, %v928_v45, %v4552_v48  ;;  %622 = vmatprep.mubr.f32.mxu0 %v4164_v0  ;;  %p4100_p1 = pnand %p4099_p10, %p4093_p13 }
  0xec   : > { %v4557_v50 = vpop.permute.xlu1 %915  ;;  %3473 = vmatprep.subr.msk.mxu0 %vm533_vm2, %v935_v49  ;;  %2562 = vperm.xlu0 %4004, %v2544_v59  }
  0xee   : > { %3456 = vmatmul.mubr.msk.f32.gmra.mrb[6].mxu0 %vm524_vm0, %v4547_v46  ;;  %v4562_v51 = vpop.permute.xlu0 %913  ;;  %2599 = vperm.xlu1 %4005, %v2593_v62  }
  0xef   : > { %793 = vmatprep.mubr.f32.mxu0 %v4164_v0 }
  0xf0   : > { %v4572_v55 = vpop.permute.xlu1 %919  ;;  %2604 = vperm.xlu0 %4004, %v2594_v63  }
  0xf2   : > { %3464 = vmatmul.mubr.msk.f32.vlgmr.msra.gmra.mrb[0].mxu0 %vm524_vm0, %v4431_v3  ;;  %v4576_v57 = vpop.permute.xlu0 %917  ;;  %2609 = vperm.xlu1 %4005, %v2595_v6  }
  0xf3   : > { %3474 = vmatpush1.msk.msra.mxu0 %vm533_vm2, %v934_v54  ;;  %799 = vmatprep.mubr.f32.mxu0 %v4164_v0 }
  0xf4   : > { %v4586_v60 = vpop.permute.xlu1 %1163  ;;  %2614 = vperm.xlu0 %4004, %v2596_v8  }
  0xf6   : > { %3465 = vmatmul.mubr.msk.f32.gmra.mrb[2].mxu0 %vm524_vm0, %v4447_v7  ;;  %v1162_v61 = vpop.permute.xlu0 %1161 }
  0xf7   : > { %v1169_v1 = vsel %vm1167_vm4, %v1162_v61, %v4586_v60  ;;  %805 = vmatprep.mubr.f32.mxu0 %v4164_v0 }
  0xf8   : > { %v4599_v2 = vpop.permute.xlu1 %1147  ;;  %3484 = vmatprep.subr.msk.mxu0 %vm533_vm2, %v1169_v1 }
  0xfa   : > { %3466 = vmatmul.mubr.msk.f32.gmra.mrb[4].mxu0 %vm524_vm0, %v4440_v5  ;;  %v1160_v4 = vpop.permute.xlu0 %1159 }
  0xfb   : > { %811 = vmatprep.mubr.f32.mxu0 %v4164_v0  ;;  %v1168_v12 = vsel %vm1167_vm4, %v1160_v4, %v1162_v61 }
  0xfc   : > { %v4611_v10 = vpop.permute.xlu1 %1151 }
  0xfe   : > { %3467 = vmatmul.mubr.msk.f32.gmra.mrb[6].mxu0 %vm524_vm0, %v4454_v9  ;;  %v4615_v11 = vpop.permute.xlu0 %1149 }
  0xff   : > { %1015 = vmatprep.mubr.f32.mxu0 %v4164_v0 }
 0x100   : > { %v1396_v13 = vpop.permute.xlu1 %1395 }
 0x102   : > { %3475 = vmatmul.mubr.msk.f32.vlgmr.msra.gmra.mrb[0].mxu0 %vm524_vm0, %v4562_v51  ;;  %v4621_v14 = vpop.permute.xlu0 %1153 }
 0x103   : > { %3485 = vmatpush1.msk.msra.mxu0 %vm533_vm2, %v1168_v12  ;;  %1021 = vmatprep.mubr.f32.mxu0 %v4164_v0 }
 0x104   : > { %v1394_v15 = vpop.permute.xlu1 %1393 }
 0x105   : > { %v1402_v22 = vsel %vm1401_vm5, %v1394_v15, %v1396_v13 }
 0x106   : > { %3476 = vmatmul.mubr.msk.f32.gmra.mrb[2].mxu0 %vm524_vm0, %v4557_v50  ;;  %v4627_v16 = vpop.permute.xlu0 %1397 }
 0x107   : > { %v1403_v17 = vsel %vm1401_vm5, %v1396_v13, %v4627_v16  ;;  %1027 = vmatprep.mubr.f32.mxu0 %v4164_v0  ;;  %v4181_v13 = vmov 0.0|0.0  }
 0x108   : > { %v4632_v18 = vpop.permute.xlu1 %1383  ;;  %3495 = vmatprep.subr.msk.mxu0 %vm533_vm2, %v1403_v17 }
 0x10a   : > { %3477 = vmatmul.mubr.msk.f32.gmra.mrb[4].mxu0 %vm524_vm0, %v4576_v57  ;;  %v4637_v19 = vpop.permute.xlu0 %1381 }
 0x10b   : > { %1033 = vmatprep.mubr.f32.mxu0 %v4164_v0 }
 0x10c   : > { %v4640_v20 = vpop.permute.xlu1 %1387 }
 0x10e   : > { %3478 = vmatmul.mubr.msk.f32.gmra.mrb[6].mxu0 %vm524_vm0, %v4572_v55  ;;  %v4644_v21 = vpop.permute.xlu0 %1385 }
 0x10f   : > { %1249 = vmatprep.mubr.f32.mxu0 %v4164_v0 }
 0x110   : > { %v4648_v23 = vpop.permute.xlu1 %1631 }
 0x112   : > { %3486 = vmatmul.mubr.msk.f32.vlgmr.msra.gmra.mrb[0].mxu0 %vm524_vm0, %v4599_v2  ;;  %v1630_v24 = vpop.permute.xlu0 %1629 }
 0x113   : > { %3496 = vmatpush1.msk.msra.mxu0 %vm533_vm2, %v1402_v22  ;;  %v1637_v25 = vsel %vm1635_vm6, %v1630_v24, %v4648_v23  ;;  %1255 = vmatprep.mubr.f32.mxu0 %v4164_v0 }
 0x114   : > { %v4656_v26 = vpop.permute.xlu1 %1615  ;;  %3506 = vmatprep.subr.msk.mxu0 %vm533_vm2, %v1637_v25 }
 0x116   : > { %3487 = vmatmul.mubr.msk.f32.gmra.mrb[2].mxu0 %vm524_vm0, %v4615_v11  ;;  %v1628_v27 = vpop.permute.xlu0 %1627 }
 0x117   : > { %1261 = vmatprep.mubr.f32.mxu0 %v4164_v0  ;;  %v1636_v34 = vsel %vm1635_vm6, %v1628_v27, %v1630_v24 }
 0x118   : > { %v519_v28 = vpop.permute.xlu1 %518 }
 0x119   : > { %v523_v29 = vsel %vm520_vm1, %v4526_v39, %v519_v28 }
 0x11a   : > { %3644 = vmatprep.subr.msk.mxu1 %vm533_vm2, %v523_v29  ;;  %3488 = vmatmul.mubr.msk.f32.gmra.mrb[4].mxu0 %vm524_vm0, %v4611_v10  ;;  %v4668_v31 = vpop.permute.xlu0 %1617 }
 0x11b   : > { %3645 = vmatpush3.msk.msra.mxu1 %vm533_vm2, %v523_v29  ;;  %1267 = vmatprep.mubr.f32.mxu0 %v4164_v0 }
 0x11c   : > { %v4672_v32 = vpop.permute.xlu1 %1621  ;;  %3647 = vmatmul.mubr.msk.f32.vlgmr.msra.gmra.mrb[0].mxu1 %vm524_vm0, %v4537_v44  ;;  %3652 = vmatprep.subr.msk.mxu1 %vm533_vm2, %v490_v30 }
 0x11d   : > { %3649 = vmatprep.mubr.msk.f32.mxu1 %vm524_vm0, %v4530_v42  ;;  %3653 = vmatpush3.msk.msra.mxu1 %vm533_vm2, %v490_v30 }
 0x11e   : > { %3489 = vmatmul.mubr.msk.f32.gmra.mrb[6].mxu0 %vm524_vm0, %v4621_v14  ;;  %v4682_v33 = vpop.permute.xlu0 %1619 }
 0x11f   : > { %1483 = vmatprep.mubr.f32.mxu0 %v4164_v0 }
 0x120   : > { %v4686_v35 = vpop.permute.xlu1 %1865  ;;  %3650 = vmatmul.mubr.msk.f32.gmra.mrb[2].mxu1 %vm524_vm0, %v4547_v46 }
 0x121   : > { %3654 = vmatprep.mubr.msk.f32.mxu1 %vm524_vm0, %v4431_v3 }
 0x122   : > { %3497 = vmatmul.mubr.msk.f32.vlgmr.msra.gmra.mrb[0].mxu0 %vm524_vm0, %v4637_v19  ;;  %v1864_v36 = vpop.permute.xlu0 %1863 }
 0x123   : > { %3507 = vmatpush1.msk.msra.mxu0 %vm533_vm2, %v1636_v34  ;;  %v1871_v37 = vsel %vm1869_vm7, %v1864_v36, %v4686_v35  ;;  %1489 = vmatprep.mubr.f32.mxu0 %v4164_v0 }
 0x124   : > { %v4698_v38 = vpop.permute.xlu1 %1849  ;;  %3655 = vmatmul.mubr.msk.f32.vlgmr.msra.gmra.mrb[0].mxu1 %vm524_vm0, %v4447_v7  ;;  %3517 = vmatprep.subr.msk.mxu0 %vm533_vm2, %v1871_v37 }
 0x125   : > { %3657 = vmatprep.mubr.msk.f32.mxu1 %vm524_vm0, %v4440_v5 }
 0x126   : > { %3498 = vmatmul.mubr.msk.f32.gmra.mrb[2].mxu0 %vm524_vm0, %v4632_v18  ;;  %v1862_v3 = vpop.permute.xlu0 %1861 }
 0x127   : > { %1495 = vmatprep.mubr.f32.mxu0 %v4164_v0  ;;  %v1870_v41 = vsel %vm1869_vm7, %v1862_v3, %v1864_v36 }
 0x128   : > { %v932_v39 = vpop.permute.xlu1 %931  ;;  %3658 = vmatmul.mubr.msk.f32.gmra.mrb[2].mxu1 %vm524_vm0, %v4454_v9 }
 0x129   : > { %v936_v40 = vsel %vm933_vm3, %v4552_v48, %v932_v39  ;;  %3662 = vmatprep.mubr.msk.f32.mxu1 %vm524_vm0, %v4562_v51 }
 0x12a   : > { %3660 = vmatprep.subr.msk.mxu1 %vm533_vm2, %v936_v40  ;;  %3499 = vmatmul.mubr.msk.f32.gmra.mrb[4].mxu0 %vm524_vm0, %v4644_v21  ;;  %v4717_v5 = vpop.permute.xlu0 %1851 }
 0x12b   : > { %3661 = vmatpush3.msk.msra.mxu1 %vm533_vm2, %v936_v40  ;;  %1501 = vmatprep.mubr.f32.mxu0 %v4164_v0 }
 0x12c   : > { %v4721_v7 = vpop.permute.xlu1 %1855  ;;  %3663 = vmatmul.mubr.msk.f32.vlgmr.msra.gmra.mrb[0].mxu1 %vm524_vm0, %v4557_v50 }
 0x12d   : > { %3665 = vmatprep.mubr.msk.f32.mxu1 %vm524_vm0, %v4576_v57 }
 0x12e   : > { %3500 = vmatmul.mubr.msk.f32.gmra.mrb[6].mxu0 %vm524_vm0, %v4640_v20  ;;  %v4729_v9 = vpop.permute.xlu0 %1853 }
 0x12f   : > { %1717 = vmatprep.mubr.f32.mxu0 %v4164_v0 }
 0x130   : > { %v2098_v42 = vpop.permute.xlu1 %2097  ;;  %3666 = vmatmul.mubr.msk.f32.gmra.mrb[2].mxu1 %vm524_vm0, %v4572_v55 }
 0x131   : > { %3670 = vmatprep.mubr.msk.f32.mxu1 %vm524_vm0, %v4599_v2 }
 0x132   : > { %3508 = vmatmul.mubr.msk.f32.vlgmr.msra.gmra.mrb[0].mxu0 %vm524_vm0, %v4656_v26  ;;  %v1166_v43 = vpop.permute.xlu0 %1165 }
 0x133   : > { %3518 = vmatpush1.msk.msra.mxu0 %vm533_vm2, %v1870_v41  ;;  %v1170_v44 = vsel %vm1167_vm4, %v4586_v60, %v1166_v43  ;;  %1723 = vmatprep.mubr.f32.mxu0 %v4164_v0 }
 0x134   : > { %v2096_v45 = vpop.permute.xlu1 %2095  ;;  %3668 = vmatprep.subr.msk.mxu1 %vm533_vm2, %v1170_v44 }
 0x135   : > { %3669 = vmatpush3.msk.msra.mxu1 %vm533_vm2, %v1170_v44  ;;  %v2104_v54 = vsel %vm2103_vm8, %v2096_v45, %v2098_v42 }
 0x136   : > { %3671 = vmatmul.mubr.msk.f32.vlgmr.msra.gmra.mrb[0].mxu1 %vm524_vm0, %v4615_v11  ;;  %3509 = vmatmul.mubr.msk.f32.gmra.mrb[2].mxu0 %vm524_vm0, %v4668_v31  ;;  %v4749_v46 = vpop.permute.xlu0 %2099 }
 0x137   : > { %v2105_v47 = vsel %vm2103_vm8, %v2098_v42, %v4749_v46  ;;  %3673 = vmatprep.mubr.msk.f32.mxu1 %vm524_vm0, %v4611_v10  ;;  %1729 = vmatprep.mubr.f32.mxu0 %v4164_v0 }
 0x138   : > { %v4756_v48 = vpop.permute.xlu1 %2085  ;;  %3528 = vmatprep.subr.msk.mxu0 %vm533_vm2, %v2105_v47 }
 0x13a   : > { %3674 = vmatmul.mubr.msk.f32.gmra.mrb[2].mxu1 %vm524_vm0, %v4621_v14  ;;  %3510 = vmatmul.mubr.msk.f32.gmra.mrb[4].mxu0 %vm524_vm0, %v4682_v33  ;;  %v2084_v49 = vpop.permute.xlu0 %2083 }
 0x13b   : > { %3678 = vmatprep.mubr.msk.f32.mxu1 %vm524_vm0, %v4637_v19  ;;  %1735 = vmatprep.mubr.f32.mxu0 %v4164_v0 }
 0x13c   : > { %v4766_v50 = vpop.permute.xlu1 %2087 }
 0x13e   : > { %3511 = vmatmul.mubr.msk.f32.gmra.mrb[6].mxu0 %vm524_vm0, %v4672_v32  ;;  %v1400_v51 = vpop.permute.xlu0 %1399 }
 0x13f   : > { %v1404_v52 = vsel %vm1401_vm5, %v4627_v16, %v1400_v51  ;;  %1951 = vmatprep.mubr.f32.mxu0 %v4164_v0 }
 0x140   : > { %v1634_v53 = vpop.permute.xlu1 %1633  ;;  %3676 = vmatprep.subr.msk.mxu1 %vm533_vm2, %v1404_v52 }
 0x141   : > { %v1638_v55 = vsel %vm1635_vm6, %v4648_v23, %v1634_v53  ;;  %3677 = vmatpush3.msk.msra.mxu1 %vm533_vm2, %v1404_v52 }
 0x142   : > { %3679 = vmatmul.mubr.msk.f32.vlgmr.msra.gmra.mrb[0].mxu1 %vm524_vm0, %v4632_v18  ;;  %3684 = vmatprep.subr.msk.mxu1 %vm533_vm2, %v1638_v55  ;;  %v2090_v56 = vpop.permute.xlu0 %2089 }
 0x143   : > { %3519 = vmatmul.mubr.msk.f32.vlgmr.msra.gmra.mrb[0].mxu0 %vm524_vm0, %v4698_v38  ;;  %3681 = vmatprep.mubr.msk.f32.mxu1 %vm524_vm0, %v4644_v21 }
 0x144   : > { %3529 = vmatpush1.msk.msra.mxu0 %vm533_vm2, %v2104_v54  ;;  %3685 = vmatpush3.msk.msra.mxu1 %vm533_vm2, %v1638_v55  ;;  %v2334_v57 = vpop.permute.xlu1 %2333 }
 0x145   : > { %1957 = vmatprep.mubr.f32.mxu0 %v4164_v0 }
 0x146   : > { %3682 = vmatmul.mubr.msk.f32.gmra.mrb[2].mxu1 %vm524_vm0, %v4640_v20  ;;  %v2332_v58 = vpop.permute.xlu0 %2331 }
 0x147   : > { %3520 = vmatmul.mubr.msk.f32.gmra.mrb[2].mxu0 %vm524_vm0, %v4717_v5  ;;  %v2339_v59 = vsel %vm2337_vm9, %v2332_v58, %v2334_v57  ;;  %3686 = vmatprep.mubr.msk.f32.mxu1 %vm524_vm0, %v4656_v26 }
 0x148   : > { %v2318_v60 = vpop.permute.xlu1 %2317  ;;  %1963 = vmatprep.mubr.f32.mxu0 %v4164_v0  ;;  %3539 = vmatprep.subr.msk.mxu0 %vm533_vm2, %v2339_v59  ;;  %v2592_v59 = vld [vmem:[%s5009_s5 + $0x18] sm:$0xff] }
 0x14a   : > { %3687 = vmatmul.mubr.msk.f32.vlgmr.msra.gmra.mrb[0].mxu1 %vm524_vm0, %v4668_v31  ;;  %v2330_v61 = vpop.permute.xlu0 %2329 }
 0x14b   : > { %3521 = vmatmul.mubr.msk.f32.gmra.mrb[4].mxu0 %vm524_vm0, %v4729_v9  ;;  %3689 = vmatprep.mubr.msk.f32.mxu1 %vm524_vm0, %v4682_v33  ;;  %v2338_v4 = vsel %vm2337_vm9, %v2330_v61, %v2332_v58  ;;  %v2591_v58 = vld [vmem:[%s5009_s5 + $0x10] sm:$0xff]  ;;  %v2806_v61 = vld [vmem:[%s5011_s7 + $0x8] sm:$0xff] }
 0x14c   : > { %v1868_v62 = vpop.permute.xlu1 %1867  ;;  %1969 = vmatprep.mubr.f32.mxu0 %v4164_v0 }
 0x14d   : > { %v1872_v63 = vsel %vm1869_vm7, %v4686_v35, %v1868_v62 }
 0x14e   : > { %3690 = vmatmul.mubr.msk.f32.gmra.mrb[2].mxu1 %vm524_vm0, %v4672_v32  ;;  %3692 = vmatprep.subr.msk.mxu1 %vm533_vm2, %v1872_v63  ;;  %v2320_v1 = vpop.permute.xlu0 %2319 }
 0x14f   : > { %3522 = vmatmul.mubr.msk.f32.gmra.mrb[6].mxu0 %vm524_vm0, %v4721_v7  ;;  %3693 = vmatpush3.msk.msra.mxu1 %vm533_vm2, %v1872_v63  ;;  %v2807_v63 = vld [vmem:[%s5011_s7 + $0x10] sm:$0xff] }
 0x150   : > { %3694 = vmatprep.mubr.msk.f32.mxu1 %vm524_vm0, %v4698_v38  ;;  %v2324_v2 = vpop.permute.xlu1 %2323  ;;  %2185 = vmatprep.mubr.f32.mxu0 %v4164_v0 }
 0x152   : > { %3695 = vmatmul.mubr.msk.f32.vlgmr.msra.gmra.mrb[0].mxu1 %vm524_vm0, %v4717_v5  ;;  %v2322_v6 = vpop.permute.xlu0 %2321 }
 0x153   : > { %3530 = vmatmul.mubr.msk.f32.vlgmr.msra.gmra.mrb[0].mxu0 %vm524_vm0, %v2084_v49  ;;  %3697 = vmatprep.mubr.msk.f32.mxu1 %vm524_vm0, %v4729_v9 }
 0x154   : > { %3540 = vmatpush1.msk.msra.mxu0 %vm533_vm2, %v2338_v4  ;;  %v2336_v8 = vpop.permute.xlu1 %2335  ;;  %2191 = vmatprep.mubr.f32.mxu0 %v4164_v0  ;;  %v4901_v4 = vld [vmem:[%s4401_s20] sm:$0xff]  ;;  %s5050_s20 = smov %s5049_s25 }
 0x155   : > { %v2340_v11 = vsel %vm2337_vm9, %v2334_v57, %v2336_v8  ;;  %3824 = vmatprep.subr.bf16.mxu0 %v4181_v13  ;;  %v2590_v57 = vld [vmem:[%s5009_s5 + $0x8] sm:$0xff] }
 0x156   : > { %3698 = vmatmul.mubr.msk.f32.gmra.mrb[2].mxu1 %vm524_vm0, %v4721_v7  ;;  %v2102_v10 = vpop.permute.xlu0 %2101 }
 0x157   : > { %3531 = vmatmul.mubr.msk.f32.gmra.mrb[2].mxu0 %vm524_vm0, %v4756_v48  ;;  %v2106_v12 = vsel %vm2103_vm8, %v4749_v46, %v2102_v10  ;;  %3702 = vmatprep.mubr.msk.f32.mxu1 %vm524_vm0, %v2084_v49 }
 0x158   : > { %3700 = vmatprep.subr.msk.mxu1 %vm533_vm2, %v2106_v12  ;;  %2197 = vmatprep.mubr.f32.mxu0 %v4164_v0 }
 0x159   : > { %3701 = vmatpush3.msk.msra.mxu1 %vm533_vm2, %v2106_v12 }
 0x15a   : > { %3703 = vmatmul.mubr.msk.f32.vlgmr.msra.gmra.mrb[0].mxu1 %vm524_vm0, %v4756_v48  ;;  %3708 = vmatprep.subr.msk.mxu1 %vm533_vm2, %v2340_v11 }
 0x15b   : > { %3532 = vmatmul.mubr.msk.f32.gmra.mrb[4].mxu0 %vm524_vm0, %v4766_v50  ;;  %3705 = vmatprep.mubr.msk.f32.mxu1 %vm524_vm0, %v4766_v50 }
 0x15c   : > { %3709 = vmatpush3.msk.msra.mxu1 %vm533_vm2, %v2340_v11  ;;  %2203 = vmatprep.mubr.f32.mxu0 %v4164_v0 }
 0x15e   : > { %3706 = vmatmul.mubr.msk.f32.gmra.mrb[2].mxu1 %vm524_vm0, %v2090_v56 }
 0x15f   : > { %3533 = vmatmul.mubr.msk.f32.gmra.mrb[6].mxu0 %vm524_vm0, %v2090_v56  ;;  %3710 = vmatprep.mubr.msk.f32.mxu1 %vm524_vm0, %v2318_v60  ;;  %v2589_v56 = vld [vmem:[%s5009_s5] sm:$0xff] }
 0x160   : > { %2419 = vmatprep.mubr.f32.mxu0 %v4164_v0 }
 0x162   : > { %3711 = vmatmul.mubr.msk.f32.vlgmr.msra.gmra.mrb[0].mxu1 %vm524_vm0, %v2320_v1 }
 0x163   : > { %3541 = vmatmul.mubr.msk.f32.vlgmr.msra.gmra.mrb[0].mxu0 %vm524_vm0, %v2318_v60  ;;  %3713 = vmatprep.mubr.msk.f32.mxu1 %vm524_vm0, %v2322_v6  ;;  %v2805_v60 = vld [vmem:[%s5011_s7] sm:$0xff] }
 0x164   : > { %2425 = vmatprep.mubr.f32.mxu0 %v4164_v0  ;;  %v3791_v62 = vpack.c.bf16 %v2806_v61, %v2805_v60 }
 0x165   : > { %v2553_v14 = vpop.permute.xlu1 %2552 }
 0x166   : > { %3714 = vmatmul.mubr.msk.f32.gmra.mrb[2].mxu1 %vm524_vm0, %v2324_v2 }
 0x167   : > { %3542 = vmatmul.mubr.msk.f32.gmra.mrb[2].mxu0 %vm524_vm0, %v2320_v1  ;;  %2694 = vmatprep.mubr.f32.mxu1 %v4164_v0  ;;  %v2548_v15 = vpop.permute.xlu0 %2547  ;;  %v2808_v1 = vld [vmem:[%s5011_s7 + $0x18] sm:$0xff] }
 0x168   : > { %2431 = vmatprep.mubr.f32.mxu0 %v4164_v0 }
 0x169   : > { %v2558_v23 = vpop.permute.xlu1 %2557 }
 0x16b   : > { %3543 = vmatmul.mubr.msk.f32.gmra.mrb[4].mxu0 %vm524_vm0, %v2322_v6  ;;  %v2563_v26 = vpop.permute.xlu0 %2562 }
 0x16c   : > { %2437 = vmatprep.mubr.f32.mxu0 %v4164_v0 }
 0x16d   : > { %v2600_v10 = vpop.permute.xlu1 %2599 }
 0x16f   : > { %3544 = vmatmul.mubr.msk.f32.gmra.mrb[6].mxu0 %vm524_vm0, %v2324_v2  ;;  %v3794_v2 = vpack.c.bf16 %v2808_v1, %v2807_v63  ;;  %v2605_v11 = vpop.permute.xlu0 %2604 }
 0x170   : > { %3771 = vmatprep.mubr.msk.f32.mxu0 %vm4182_vm10, %v4164_v0 }
 0x235   : > { %v3712_v16 = vpop.f32.mrb[0].mxu1 }
 0x236   : > { %v2421_v17 = vpop.f32.mrb[0].mxu0  ;;  %v2570_v18 = vadd.f32 %v3712_v16, %v2553_v14  ;;  %v2510_v19 = vpop.f32.mrb[1].mxu1 }
 0x237   : > { %v2423_v20 = vpop.f32.mrb[1].mxu0  ;;  %v2567_v21 = vadd.f32 %v2548_v15, %v2510_v19  ;;  %v2565_v24 = vadd.f32 %v2548_v15, %v2421_v17 }
 0x238   : > { %v2582_v22 = vmax.f32 %v2570_v18, 0.0  ;;  %v2566_v28 = vadd.f32 %v2548_v15, %v2423_v20 }
 0x239   : > { %v2579_v25 = vmax.f32 %v2567_v21, 0.0  ;;  %v3715_v27 = vpop.f32.mrb[2].mxu1  ;;  %v2577_v38 = vmax.f32 %v2565_v24, 0.0  ;;  %v2615_v24 = vpop.permute.xlu0 %2614 }
 0x23a   : > { %v2427_v29 = vpop.f32.mrb[2].mxu0  ;;  %v2576_v30 = vadd.f32 %v3715_v27, %v2563_v26  ;;  %v2520_v31 = vpop.f32.mrb[3].mxu1  ;;  %v2578_v40 = vmax.f32 %v2566_v28, 0.0 }
 0x23b   : > { %v3782_v32 = vpack.c.bf16 %v2582_v22, %v2579_v25  ;;  %v2568_v33 = vadd.f32 %v2553_v14, %v2427_v29  ;;  %v2429_v34 = vpop.f32.mrb[3].mxu0  ;;  %v2573_v35 = vadd.f32 %v2558_v23, %v2520_v31 }
 0x23c   : > { %v2588_v36 = vmax.f32 %v2576_v30, 0.0  ;;  %v2569_v37 = vadd.f32 %v2553_v14, %v2429_v34 }
 0x23d   : > { %v2580_v3 = vmax.f32 %v2568_v33, 0.0  ;;  %v2585_v39 = vmax.f32 %v2573_v35, 0.0 }
 0x23e   : > { %v2581_v5 = vmax.f32 %v2569_v37, 0.0  ;;  %v2433_v7 = vpop.f32.mrb[4].mxu0 }
 0x23f   : > { %v3776_v9 = vpack.c.bf16 %v2580_v3, %v2577_v38  ;;  %v3786_v41 = vpack.c.bf16 %v2588_v36, %v2585_v39  ;;  %v2435_v42 = vpop.f32.mrb[5].mxu0  ;;  %v2571_v44 = vadd.f32 %v2558_v23, %v2433_v7 }
 0x240   : > { %v3774_v43 = vpack.c.bf16 %v2581_v5, %v2578_v40  ;;  %v2572_v45 = vadd.f32 %v2558_v23, %v2435_v42  ;;  %v2610_v23 = vpop.permute.xlu1 %2609  ;;  %v3558_v5 = vld [vmem:[%s5012_s8] ss:$0 sm:$0xff] }
 0x241   : > { %v2583_v50 = vmax.f32 %v2571_v44, 0.0 }
 0x242   : > { %v2439_v46 = vpop.f32.mrb[6].mxu0  ;;  %3775 = vmatprep.subr.bf16.mxu1 %v3774_v43  ;;  %v2584_v52 = vmax.f32 %v2572_v45, 0.0  ;;  %v3038_v43 = vlaneseq }
 0x243   : > { %v2574_v47 = vadd.f32 %v2563_v26, %v2439_v46  ;;  %v2441_v48 = vpop.f32.mrb[7].mxu0  ;;  %3777 = vmatpush1.bf16.msra.mxu1 %v3776_v9  ;;  %v3036_v46 = vld [vmem:[#allocation5] sm:$0x7] }
 0x244   : > { %v2575_v49 = vadd.f32 %v2563_v26, %v2441_v48  ;;  %v3039_v44 = vshrl.u32 %v3038_v43, 7 }
 0x245   : > { %v2586_v51 = vmax.f32 %v2574_v47, 0.0 }
 0x246   : > { %v2587_v53 = vmax.f32 %v2575_v49, 0.0  ;;  %v3040_v45 = vsub.s32 0, %v3039_v44  ;;  %v3044_v47 = vsub.s32 1, %v3039_v44 }
 0x247   : > { %v3780_v54 = vpack.c.bf16 %v2586_v51, %v2583_v50 }
 0x248   : > { %v3778_v55 = vpack.c.bf16 %v2587_v53, %v2584_v52  ;;  %v3041_v50 = vrot.slane %v3036_v46, %v3040_v45  ;;  %v3045_v53 = vrot.slane %v3036_v46, %v3044_v47 }
 0x24a   : > { %3779 = vmatprep.subr.bf16.mxu1 %v3778_v55 }
 0x24b   : > { %3781 = vmatpush1.bf16.msra.mxu1 %v3780_v54  ;;  %v3048_v54 = vsub.s32 2, %v3039_v44 }
 0x24c   : > { %3783 = vmatprep.subr.bf16.mxu1 %v3782_v32 }
 0x24e   : > { %3550 = vmatmul.mubr.msk.f32.vlgmr.msra.gmra.mrb[4].mxu1 %vm2617_vm11, %v2589_v56 }
 0x24f   : > { %3785 = vmatpush3.bf16.msra.mxu1 %v3782_v32  ;;  %2700 = vmatprep.mubr.f32.mxu1 %v4164_v0 }
 0x250   : > { %3787 = vmatprep.subr.bf16.mxu1 %v3786_v41 }
 0x252   : > { %3551 = vmatmul.mubr.msk.f32.gmra.mrb[6].mxu1 %vm2617_vm11, %v2590_v57 }
 0x253   : > { %3789 = vmatpush3.bf16.msra.mxu1 %v3786_v41  ;;  %2706 = vmatprep.mubr.f32.mxu1 %v4164_v0 }
 0x254   : > { %3790 = vmatprep.subr.bf16.mxu1 %v4181_v13 }
 0x256   : > { %3552 = vmatmul.mubr.msk.f32.gmra.mrb[8].mxu1 %vm2617_vm11, %v2591_v58 }
 0x257   : > { %2712 = vmatprep.mubr.f32.mxu1 %v4164_v0 }
 0x25a   : > { %3553 = vmatmul.mubr.msk.f32.gmra.mrb[10].mxu1 %vm2617_vm11, %v2592_v59 }
 0x25b   : > { %3724 = vmatprep.mubr.msk.f32.mxu1 %vm2617_vm11, %v2589_v56 }
 0x25e   : > { %3725 = vmatmul.mubr.msk.f32.vlgmr.msra.gmra.mrb[12].mxu1 %vm2617_vm11, %v2590_v57  ;;  %v3049_v57 = vrot.slane %v3036_v46, %v3048_v54 }
 0x25f   : > { %3792 = vmatpush3.bf16.msra.mxu1 %v3791_v62  ;;  %3727 = vmatprep.mubr.msk.f32.mxu1 %vm2617_vm11, %v2591_v58 }
 0x260   : > { %3793 = vmatprep.subr.bf16.mxu1 %v4181_v13 }
 0x262   : > { %3728 = vmatmul.mubr.msk.f32.gmra.mrb[14].mxu1 %vm2617_vm11, %v2592_v59 }
 0x263   : > { %3795 = vmatpush3.bf16.msra.mxu1 %v3794_v2  ;;  %3738 = vmatprep.mubr.msk.f32.mxu1 %vm4182_vm10, %v4164_v0 }
 0x266   : > { %3739 = vmatmul.mubr.msk.f32.vlgmr.msra.gmra.mrb[16].mxu1 %vm2617_vm11, %v4901_v4 }
 0x267   : > { %2956 = vmatprep.mubr.f32.mxu1 %v4164_v0 }
 0x321   : > { %v2696_v6 = vpop.f32.mrb[4].mxu1 }
 0x322   : > { %v2698_v8 = vpop.f32.mrb[5].mxu1  ;;  %v2697_v14 = vadd.f32 %v2696_v6, %v2600_v10 }
 0x323   : > { %v2699_v17 = vadd.f32 %v2698_v8, %v2600_v10 }
 0x325   : > { %v2702_v12 = vpop.f32.mrb[6].mxu1 }
 0x326   : > { %v2703_v15 = vadd.f32 %v2702_v12, %v2605_v11  ;;  %v2704_v16 = vpop.f32.mrb[7].mxu1 }
 0x327   : > { %v2705_v18 = vadd.f32 %v2704_v16, %v2605_v11 }
 0x328   : > { %v3798_v19 = vpack.c.bf16 %v2703_v15, %v2697_v14 }
 0x329   : > { %v3796_v20 = vpack.c.bf16 %v2705_v18, %v2699_v17  ;;  %v2708_v21 = vpop.f32.mrb[8].mxu1 }
 0x32a   : > { %v2710_v22 = vpop.f32.mrb[9].mxu1  ;;  %v2709_v26 = vadd.f32 %v2708_v21, %v2610_v23  ;;  %v3219_v21 = vld [vmem:[%s5013_s9 + $0x10] sm:$0xff] }
 0x32b   : > { %3797 = vmatprep.subr.bf16.mxu1 %v3796_v20  ;;  %v2711_v29 = vadd.f32 %v2710_v22, %v2610_v23 }
 0x32c   : > { %3799 = vmatpush1.bf16.msra.mxu1 %v3798_v19 }
 0x32d   : > { %v2714_v25 = vpop.f32.mrb[10].mxu1 }
 0x32e   : > { %v2715_v27 = vadd.f32 %v2714_v25, %v2615_v24  ;;  %v2716_v28 = vpop.f32.mrb[11].mxu1 }
 0x32f   : > { %v2717_v30 = vadd.f32 %v2716_v28, %v2615_v24 }
 0x330   : > { %v3802_v31 = vpack.c.bf16 %v2715_v27, %v2709_v26 }
 0x331   : > { %v3800_v32 = vpack.c.bf16 %v2717_v30, %v2711_v29  ;;  %v3726_v33 = vpop.f32.mrb[12].mxu1 }
 0x332   : > { %v2791_v34 = vadd.f32 %v3726_v33, %v2605_v11  ;;  %v2785_v35 = vpop.f32.mrb[13].mxu1 }
 0x333   : > { %v2786_v36 = vadd.f32 %v2785_v35, %v2600_v10  ;;  %3801 = vmatprep.subr.bf16.mxu1 %v3800_v32 }
 0x334   : > { %3803 = vmatpush1.bf16.msra.mxu1 %v3802_v31 }
 0x335   : > { %v4906_v37 = vpack.c.bf16 %v2791_v34, %v2786_v36  ;;  %v3729_v38 = vpop.f32.mrb[14].mxu1  ;;  %3804 = vmatprep.subr.bf16.mxu1 %v4181_v13 }
 0x336   : > { %v2801_v3 = vadd.f32 %v3729_v38, %v2615_v24  ;;  %v2795_v39 = vpop.f32.mrb[15].mxu1 }
 0x337   : > { %v2796_v40 = vadd.f32 %v2795_v39, %v2610_v23  ;;  %v3220_v23 = vld [vmem:[%s5013_s9 + $0x18] sm:$0xff] }
 0x338   : > { %v3828_v24 = vpack.c.bf16 %v3220_v23, %v3219_v21 }
 0x339   : > { %v4912_v7 = vpack.c.bf16 %v2801_v3, %v2796_v40  ;;  %v2885_v9 = vpop.f32.mrb[16].mxu1 }
 0x33a   : > { %v2886_v41 = vadd.f32 %v3558_v5, %v2885_v9  ;;  %v3740_v42 = vpop.f32.mrb[17].mxu1 }
 0x33b   : > { %v3565_v42 = vld [vmem:[%s5016_s12] ss:$0 sm:$0xff] }
 0x33c   : > { %3560 = vmatmul.mubr.msk.f32.vlgmr.msra.gmra.mrb[18].mxu1 %vm2617_vm11, %v2886_v41 }
 0x33d   : > { %3806 = vmatpush3.bf16.msra.mxu1 %v4906_v37  ;;  %3749 = vmatprep.mubr.msk.f32.mxu1 %vm4182_vm10, %v4164_v0 }
 0x33e   : > { %3807 = vmatprep.subr.bf16.mxu1 %v4181_v13 }
 0x341   : > { %3809 = vmatpush3.bf16.msra.mxu1 %v4912_v7 }
 0x342   : > { %3811 = vmatprep.subr.bf16.mxu1 %v3796_v20  ;;  %v3218_v20 = vld [vmem:[%s5013_s9 + $0x8] sm:$0xff] }
 0x344   : > { %3750 = vmatmul.mubr.msk.f32.vlgmr.msra.gmra.mrb[20].mxu1 %vm2617_vm11, %v2886_v41 }
 0x34a   : > { %3813 = vmatpush1.bf16.xpose.msra.mxu1 %v3798_v19  ;;  %v3217_v19 = vld [vmem:[%s5013_s9] sm:$0xff] }
 0x34b   : > { %3815 = vmatprep.subr.bf16.mxu1 %v3800_v32  ;;  %v3825_v22 = vpack.c.bf16 %v3218_v20, %v3217_v19  ;;  %v3562_v32 = vld [vmem:[%s5014_s10] ss:$0 sm:$0xff] }
 0x34d   : > { %3826 = vmatpush3.bf16.msra.mxu0 %v3825_v22 }
 0x34e   : > { %3827 = vmatprep.subr.bf16.mxu0 %v4181_v13 }
 0x351   : > { %3829 = vmatpush3.bf16.msra.mxu0 %v3828_v24 }
 0x352   : > { %3817 = vmatpush1.bf16.xpose.msra.mxu1 %v3802_v31 }
 0x353   : > { %3818 = vmatprep.subr.bf16.mxu1 %v4181_v13 }
 0x40f   : > { %v2958_v48 = vpop.f32.mrb[18].mxu1 }
 0x410   : > { %v2960_v49 = vpop.f32.mrb[19].mxu1  ;;  %v3033_v51 = vmul.f32 0.17677669, %v2958_v48 }
 0x411   : > { %v3034_v52 = vmul.f32 0.17677669, %v2960_v49 }
 0x412   : > { %v3053_v55 = vadd.f32 %v3041_v50, %v3033_v51 }
 0x413   : > { %v3054_v56 = vadd.f32 %v3045_v53, %v3034_v52 }
 0x415   : > { %v3056_v62 = vmax.f32 %v3053_v55, %v3054_v56 }
 0x417   : > { %v3029_v58 = vpop.f32.mrb[20].mxu1 }
 0x418   : > { %v3035_v59 = vmul.f32 0.17677669, %v3029_v58  ;;  %v3751_v60 = vpop.f32.mrb[21].mxu1 }
 0x41a   : > { %v3055_v61 = vadd.f32 %v3049_v57, %v3035_v59 }
 0x41c   : > { %v3057_v63 = vmax.f32 %v3056_v62, %v3055_v61 }
 0x41e   : > { %3058 = vmax.xlane.f32.xlu1 %v3057_v63 }
 0x4ab   : > { %v3059_v1 = vpop.xlane.xlu1 %3058 }
 0x4ac   : > { %v3060_v2 = vsub.f32 %v3053_v55, %v3059_v1  ;;  %v3061_v6 = vsub.f32 %v3054_v56, %v3059_v1  ;;  %v3062_v8 = vsub.f32 %v3055_v61, %v3059_v1 }
 0x4ae   : > { %v3063_v10 = vmul.f32 1.442695, %v3060_v2  ;;  %v3065_v11 = vmul.f32 1.442695, %v3061_v6  ;;  %v3067_v12 = vmul.f32 1.442695, %v3062_v8 }
 0x4b0   : > { %4022 = vpow2.f32 %v3063_v10 }
 0x4b1   : > { %4024 = vpow2.f32 %v3065_v11 }
 0x4b2   : > { %4026 = vpow2.f32 %v3067_v12 }
 0x4ba   : > { %v4023_v14 = vpop.eup %4022 }
 0x4bb   : > { %v4025_v15 = vpop.eup %4024 }
 0x4bc   : > { %v3069_v16 = vadd.f32 %v4025_v15, %v4023_v14  ;;  %v4027_v17 = vpop.eup %4026 }
 0x4be   : > { %v3070_v18 = vadd.f32 %v4027_v17, %v3069_v16 }
 0x4c0   : > { %3071 = vadd.xlane.f32.xlu0 %v3070_v18 }
 0x54d   : > { %v3072_v25 = vpop.xlane.xlu0 %3071 }
 0x54e   : > { %4028 = vrcp.f32 %v3072_v25 }
 0x558   : > { %v4029_v26 = vpop.eup %4028 }
 0x559   : > { %v3075_v27 = vmul.f32 %v4029_v26, %v4025_v15  ;;  %v3074_v28 = vmul.f32 %v4029_v26, %v4023_v14  ;;  %v3076_v29 = vmul.f32 %v4029_v26, %v4027_v17 }
 0x55b   : > { %3141 = vmatprep.mubr.f32.mxu1 %v3075_v27 }
 0x55c   : > { %3142 = vmatmul.mubr.f32.vlgmr.msra.gmra.mrb[22].mxu1 %v3074_v28 }
 0x55d   : > { %3820 = vmatpush3.bf16.xpose.msra.mxu1 %v4906_v37  ;;  %3760 = vmatprep.mubr.msk.f32.mxu1 %vm4182_vm10, %v4164_v0 }
 0x55e   : > { %3821 = vmatprep.subr.bf16.mxu1 %v4181_v13 }
 0x565   : > { %3823 = vmatpush3.bf16.xpose.msra.mxu1 %v4912_v7 }
 0x56c   : > { %3761 = vmatmul.mubr.f32.vlgmr.msra.gmra.mrb[22].mxu1 %v3076_v29 }
 0x63f   : > { %v3213_v30 = vpop.f32.mrb[22].mxu1 }
 0x640   : > { %v3762_v31 = vpop.f32.mrb[23].mxu1  ;;  %3772 = vmatmul.mubr.msk.f32.vlgmr.msra.gmra.mrb[8].mxu0 %vm2617_vm11, %v3213_v30 }
 0x713   : > { %v3297_v33 = vpop.f32.mrb[8].mxu0 }
 0x714   : > { %v3298_v34 = vadd.f32 %v3562_v32, %v3297_v33  ;;  %v3773_v35 = vpop.f32.mrb[9].mxu0 }
 0x716   : > { %v3301_v36 = vadd.f32 %v3298_v34, %v4901_v4  ;;  %v3564_v4 = vld [vmem:[%s5015_s11] ss:$0 sm:$0xff] }
 0x718   : > { %v3302_v0 = vsel %vm2617_vm11, %v3301_v36, 0.0 }
 0x719   : > { %3303 = vadd.xlane.f32.xlu0 %v3302_v0 }
 0x7a6   : > { %v3304_v13 = vpop.xlane.xlu0 %3303 }
 0x7a7   : > { %v3306_v37 = vmul.f32 0.03125, %v3304_v13 }
 0x7a9   : > { %v3307_v38 = vsub.f32 %v3301_v36, %v3306_v37 }
 0x7ab   : > { %v3308_v3 = vmul.f32 %v3307_v38, %v3307_v38 }
 0x7ad   : > { %v3309_v39 = vsel %vm2617_vm11, %v3308_v3, 0.0 }
 0x7ae   : > { %3310 = vadd.xlane.f32.xlu1 %v3309_v39 }
 0x83b   : > { %v3311_v40 = vpop.xlane.xlu1 %3310 }
 0x83c   : > { %v3312_v5 = vmul.f32 0.03125, %v3311_v40 }
 0x83e   : > { %v3313_v7 = vadd.f32 1e-05, %v3312_v5 }
 0x840   : > { %4030 = vrsqrt.f32 %v3313_v7 }
 0x84a   : > { %v4031_v9 = vpop.eup %4030 }
 0x84b   : > { %v3315_v41 = vmul.f32 %v4031_v9, %v3307_v38 }
 0x84d   : > { %v3323_v43 = vmul.f32 %v3564_v4, %v3315_v41 }
 0x84f   : > { %v3331_v44 = vadd.f32 %v3565_v42, %v3323_v43 }
 0x851   : > { %3332 = vst.msk [vmem:[%s483_s24] sm:$0xff] %vm2617_vm11, %v3331_v44 }
 0x852   : > { %4103 = shalt.err (!%p4100_p1)
}
 0x853   : > { %s4104_s2 = scalar_lea.hbm %s4959_s0, 128  ;;  %s4108_s24 = scalar_lea.hbm %s5050_s20, 256 }
 0x854   : > { %p4105_p2 = scmp.ne.s32.totalorder %s4959_s0, %s4104_s2  ;;  %p4109_p11 = scmp.lt.u32.totalorder %s4959_s0, %s5050_s20 }
 0x855   : > { %p4110_p4 = scmp.lt.u32.totalorder %s4108_s24, %s4104_s2  ;;  %p4112_p9 = scmp.lt.u32.totalorder %s4104_s2, %s4959_s0 }
 0x856   : > { %p4106_p7 = pnand %p4105_p2, %p4346_p8 }
 0x857   : > { %p4111_p6 = por %p4110_p4, %p4109_p11 }
 0x858   : > { %p4107_p3 = pneg %p4106_p7 }
 0x859   : > { %p4113_p12 = por %p4112_p9, %p4111_p6 }
 0x85b   : > { %p4114_p13 = pnand %p4113_p12, %p4107_p3 }
 0x85d   : > { %4117 = shalt.err (!%p4114_p13)
}
 0x85e   : > { %3934 = dma.vmem_to_hbm [thread:$0]  (%p4346_p8), %s4961_s16, 128, %s4959_s0, %s3334_s17  }
 0x85f PF: > { %s5051_s25 = sld [smem:[#allocation11_spill]]  ;;  %s5052_s22 = sld [smem:[#allocation12_spill]] }
 0x860   : > { %p5054_p5 = scmp.ge.s32.totalorder %s4160_s28, 2 }
 0x865   : > { %s3359_s29 = sand.u32 1, %s5051_s25   ;;  %p5053_p0 = scmp.ne.s32.totalorder %s5052_s22, 0 }
 0x866   : > { %s3360_s21 = scalar_lea.sflag [#allocation4], %s3359_s29 }
 0x867   : > { %p3945_p10 = pnand %p5054_p5, %p5053_p0 }
 0x869   : > { %4143 = dma.done.wait (!%p3945_p10), %s3360_s21, 128  }
 0x86a   : > { %4145 = vsyncadd (!%p3945_p10), %s3360_s21, 4294967168  ;;  %s5055_s28 = sld [smem:[#allocation13_spill]]  ;;  %s5056_s25 = smov %s4152_s26 }
 0x86b   : > { %s5057_s26 = smov %s4156_s27  ;;  %s5058_s27 = smov %s4338_s13 }
 0x870   : > { %p27_p1 = scmp.ge.s32.totalorder %s5055_s28, 4  }
 0x872   :  { %29 = sbr.rel (!%p27_p1) target bundleno = 10 (0xa), region = 124 }
 0x879   :  { %3365 = vsyncpa [#allocation3], 1 }
 0x87a   :  { %3367 = vsyncpa [#allocation3 + $0x1], 1 }
 0x87b   :  { %3368 = vsyncpa [#allocation6], 1 }
 0x87c   :  { %3369 = vsyncpa [#allocation4], 1 }
 0x87d   :  { %3371 = vsyncpa [#allocation4 + $0x1], 1 }

</bundles_post_ra>
